<compile_context>
chip_gen: v7x
topology: tpu7x:2x2x1
jax: 0.10.0
libtpu: 0.0.40
codegen_flags: <defaults>
</compile_context>

<pallas_src>
import jax
import jax.numpy as jnp
from jax.experimental import pallas as pl
from jax.experimental.pallas import tpu as pltpu

N_EMBD = 384
HIDDEN = 4 * N_EMBD
DROPOUT = 0.2          # inactive in eval mode
H_CHUNK = 512          # hidden-dim chunk width (multiple of 128)


def _round_up(x, m):
    return ((x + m - 1) // m) * m


def ffn_kernel(x_ref, w1_ref, b1_ref, w2_ref, b2_ref, o_ref):
    # x_ref: (tm, C) f32/bf16; w1_ref: (C, H) bf16; b1_ref: (1, H) f32;
    # w2_ref: (H, C) bf16; b2_ref: (1, C) f32; o_ref: (tm, C) f32.
    tm, C = o_ref.shape
    H = w1_ref.shape[1]
    hc = H_CHUNK if H % H_CHUNK == 0 else H     # fall back to unchunked
    n_chunks = H // hc

    x_bf = x_ref[...].astype(jnp.bfloat16)
    acc = jnp.zeros((tm, C), jnp.float32)

    # Static (unrolled) chunk loop over the hidden dim.  Slices are aligned to
    # (8,128) tile boundaries (hc is a multiple of 128/8), so they are cheap
    # VMEM loads, and the scheduler can overlap the VPU bias/ReLU/cast of
    # chunk k+1 with the MXU matmul2 of chunk k.
    for k in range(n_chunks):
        sl = pl.ds(k * hc, hc)
        # matmul1 chunk: bf16 x bf16 -> f32 accumulation on the MXU.
        h = jnp.dot(x_bf, w1_ref[:, sl], preferred_element_type=jnp.float32)
        # bias + ReLU epilogue in f32 (v5e VPU has no bf16 ALU).
        h = jnp.maximum(h + b1_ref[:, sl], 0.0)
        # matmul2 chunk, accumulated in f32.
        acc = acc + jnp.dot(h.astype(jnp.bfloat16), w2_ref[sl, :],
                            preferred_element_type=jnp.float32)

    # Dropout(0.2) in eval mode == identity.
    o_ref[...] = (acc + b2_ref[...]).astype(o_ref.dtype)


def _pick_row_tile(M, tm):
    """Pick a sublane-aligned row tile that avoids gross padding and gives
    >= 2 grid steps when feasible (so v7x's two TensorCores both get work)."""
    M8 = _round_up(M, 8)
    tm_eff = min(tm, M8)
    # Halve while the tile would (a) force a single grid step or (b) force
    # padding of the 8-aligned row count; stop at 128 to keep the ~0.35us
    # per-step pipeline overhead amortized.
    while tm_eff > 128 and (M8 % tm_eff != 0 or M8 == tm_eff):
        tm_eff = _round_up(tm_eff // 2, 8)
    M_pad = _round_up(M8, tm_eff)
    return tm_eff, M_pad


def feed_forward(x, w1, b1, w2, b2, *, tm=512):
    """x: (B,T,C); w1: (C,H); b1: (H,); w2: (H,C); b2: (C,). Returns (B,T,C) f32."""
    B, T, C = x.shape
    H = w1.shape[1]
    M = B * T

    tm_eff, M_pad = _pick_row_tile(M, tm)
    grid_m = M_pad // tm_eff

    # Keep x in its native dtype (f32 or bf16); the kernel casts to bf16 for
    # the MXU.  Pad only when the row count is ragged (padded rows are pure
    # filler, sliced off before returning).
    x2 = x.reshape(M, C)
    if M_pad != M:
        x2 = jnp.pad(x2, ((0, M_pad - M), (0, 0)))

    # bf16 weights feed the MXU at full rate and halve weight DMA/VMEM.
    w1_bf = w1.astype(jnp.bfloat16)
    w2_bf = w2.astype(jnp.bfloat16)
    b1_2 = b1.reshape(1, H).astype(jnp.float32)
    b2_2 = b2.reshape(1, C).astype(jnp.float32)

    # VMEM footprint: double-buffered activation/output tiles, single-buffered
    # bf16 weights, live f32 accumulator + hidden chunk; plus headroom.
    x_bytes = jnp.dtype(x2.dtype).itemsize
    vmem_bytes = (2 * tm_eff * C * x_bytes          # x tiles (double-buffered)
                  + 2 * tm_eff * C * 4              # out tiles (double-buffered)
                  + 2 * C * H * 2                   # bf16 W1 + W2 (single-buffered)
                  + (H + C) * 4 * 8                 # bias tiles (8-row VMEM pad)
                  + 2 * tm_eff * (C + H_CHUNK) * 4)  # live acc + hidden chunk
    vmem_limit = max(16 << 20, min(40 << 20, vmem_bytes + (12 << 20)))

    # Advisory cost for XLA's scheduler: two matmuls over M_pad rows.
    flops = 4 * M_pad * C * H
    bytes_accessed = (M_pad * C * (x_bytes + 4)     # x in + f32 out
                      + 2 * C * H * 2               # bf16 weights
                      + (H + C) * 4)                # biases

    out = pl.pallas_call(
        ffn_kernel,
        out_shape=jax.ShapeDtypeStruct((M_pad, C), jnp.float32),
        grid_spec=pltpu.PrefetchScalarGridSpec(
            num_scalar_prefetch=0,
            grid=(grid_m,),
            in_specs=[
                # Row tile of activations (double-buffered by default).
                pl.BlockSpec((tm_eff, C), lambda i: (i, 0)),
                # Weights are grid-invariant -> single-buffer them; double
                # buffering would only waste VMEM.
                pl.BlockSpec((C, H), lambda i: (0, 0),
                             pipeline_mode=pl.Buffered(1)),
                pl.BlockSpec((1, H), lambda i: (0, 0)),
                pl.BlockSpec((H, C), lambda i: (0, 0),
                             pipeline_mode=pl.Buffered(1)),
                pl.BlockSpec((1, C), lambda i: (0, 0)),
            ],
            out_specs=pl.BlockSpec((tm_eff, C), lambda i: (i, 0)),
        ),
        compiler_params=pltpu.CompilerParams(
            # Row axis is independent -> megacore / v7x dual-TC sharding.
            dimension_semantics=("parallel",),
            vmem_limit_bytes=int(vmem_limit),
        ),
        cost_estimate=pl.CostEstimate(
            flops=flops, transcendentals=0, bytes_accessed=bytes_accessed),
    )(x2, w1_bf, b1_2, w2_bf, b2_2)

    if M_pad != M:
        out = out[:M]
    return out.reshape(B, T, C)


def reference_ffn_f32(x, w1, b1, w2, b2):
    h = jnp.maximum(jnp.einsum("btc,ch->bth", x, w1) + b1, 0.0)
    return jnp.einsum("bth,hc->btc", h, w2) + b2


def reference_ffn_bf16(x, w1, b1, w2, b2):
    # Mirrors the kernel's numerics: bf16 operands, f32 accumulation/epilogue.
    h = jnp.einsum("btc,ch->bth",
                   x.astype(jnp.bfloat16), w1.astype(jnp.bfloat16),
                   preferred_element_type=jnp.float32) + b1
    h = jnp.maximum(h, 0.0)
    return jnp.einsum("bth,hc->btc",
                      h.astype(jnp.bfloat16), w2.astype(jnp.bfloat16),
                      preferred_element_type=jnp.float32) + b2


if __name__ == "__main__":
    key = jax.random.PRNGKey(0)
    k_x, k_w1, k_b1, k_w2, k_b2 = jax.random.split(key, 5)

    B, T = 2, 8  # small seq/batch; n_embd fixed at 384 by the module
    x = jax.random.normal(k_x, (B, T, N_EMBD), dtype=jnp.float32)

    # Deterministic init mimicking nn.Linear's uniform(-1/sqrt(fan_in), ...).
    bound1 = 1.0 / (N_EMBD ** 0.5)
    bound2 = 1.0 / (HIDDEN ** 0.5)
    # Stored as (in, out), i.e. transpose of PyTorch's (out, in).
    w1 = jax.random.uniform(k_w1, (N_EMBD, HIDDEN), jnp.float32, -bound1, bound1)
    b1 = jax.random.uniform(k_b1, (HIDDEN,), jnp.float32, -bound1, bound1)
    w2 = jax.random.uniform(k_w2, (HIDDEN, N_EMBD), jnp.float32, -bound2, bound2)
    b2 = jax.random.uniform(k_b2, (N_EMBD,), jnp.float32, -bound2, bound2)

    y = feed_forward(x, w1, b1, w2, b2)
    jax.block_until_ready(y)
    assert y.shape == (B, T, N_EMBD)

    # Tight check against a bf16-matmul reference (same numerics as kernel).
    y_ref_bf16 = reference_ffn_bf16(x, w1, b1, w2, b2)
    assert jnp.allclose(y, y_ref_bf16, atol=1e-3, rtol=1e-3)

    # Loose check against the full-f32 PyTorch-equivalent math.
    y_ref_f32 = reference_ffn_f32(x, w1, b1, w2, b2)
    assert jnp.allclose(y, y_ref_f32, atol=3e-2, rtol=3e-2)

    print("KERNEL_OK")
</pallas_src>

<mosaic_0001>
module attributes {stable_mosaic.version = 11 : i64} {
  func.func @ffn_kernel(%arg0: i32, %arg1: memref<16x384xf32, #tpu.memory_space<vmem>>, %arg2: memref<384x1536xbf16, #tpu.memory_space<vmem>>, %arg3: memref<1x1536xf32, #tpu.memory_space<vmem>>, %arg4: memref<1536x384xbf16, #tpu.memory_space<vmem>>, %arg5: memref<1x384xf32, #tpu.memory_space<vmem>>, %arg6: memref<16x384xf32, #tpu.memory_space<vmem>>) attributes {dimension_semantics = [#tpu.dimension_semantics<parallel>], iteration_bounds = array<i64: 1>, scalar_prefetch = 0 : i64, scratch_operands = 0 : i64, tpu.core_type = #tpu.core_type<tc>, window_params = [{transform_indices = @transform_0, window_bounds = array<i64: 16, 384>}, {pipeline_mode = #tpu.pipeline_mode<synchronous>, transform_indices = @transform_1, window_bounds = array<i64: 384, 1536>}, {pipeline_mode = #tpu.pipeline_mode<synchronous>, transform_indices = @transform_2, window_bounds = array<i64: 1, 1536>}, {pipeline_mode = #tpu.pipeline_mode<synchronous>, transform_indices = @transform_3, window_bounds = array<i64: 1536, 384>}, {pipeline_mode = #tpu.pipeline_mode<synchronous>, transform_indices = @transform_4, window_bounds = array<i64: 1, 384>}, {transform_indices = @transform_5, window_bounds = array<i64: 16, 384>}]} {
    %c0 = arith.constant 0 : index
    %c0_0 = arith.constant 0 : index
    %0 = vector.load %arg1[%c0, %c0_0] : memref<16x384xf32, #tpu.memory_space<vmem>>, vector<16x384xf32>
    %1 = arith.truncf %0 : vector<16x384xf32> to vector<16x384xbf16>
    %cst = arith.constant 0.000000e+00 : f32
    %2 = vector.broadcast %cst : f32 to vector<16x384xf32>
    %c0_1 = arith.constant 0 : index
    %c0_2 = arith.constant 0 : index
    %3 = vector.load %arg2[%c0_1, %c0_2] : memref<384x1536xbf16, #tpu.memory_space<vmem>>, vector<384x512xbf16>
    %cst_3 = arith.constant dense<0.000000e+00> : vector<16x512xf32>
    %4 = tpu.matmul %1, %3, %cst_3 {dimension_numbers = #tpu.dot_dimension_numbers<[1], [0], [0], [1], [0, 0, 1, 1], [], []>} : vector<16x384xbf16>, vector<384x512xbf16>, vector<16x512xf32> -> vector<16x512xf32>
    %c0_4 = arith.constant 0 : index
    %c0_5 = arith.constant 0 : index
    %5 = vector.load %arg3[%c0_4, %c0_5] : memref<1x1536xf32, #tpu.memory_space<vmem>>, vector<1x512xf32>
    %6 = vector.broadcast %5 : vector<1x512xf32> to vector<16x512xf32>
    %7 = arith.addf %4, %6 : vector<16x512xf32>
    %cst_6 = arith.constant 0.000000e+00 : f32
    %8 = vector.broadcast %cst_6 : f32 to vector<16x512xf32>
    %9 = arith.maximumf %7, %8 : vector<16x512xf32>
    %10 = arith.truncf %9 : vector<16x512xf32> to vector<16x512xbf16>
    %c0_7 = arith.constant 0 : index
    %c0_8 = arith.constant 0 : index
    %11 = vector.load %arg4[%c0_7, %c0_8] : memref<1536x384xbf16, #tpu.memory_space<vmem>>, vector<512x384xbf16>
    %cst_9 = arith.constant dense<0.000000e+00> : vector<16x384xf32>
    %12 = tpu.matmul %10, %11, %cst_9 {dimension_numbers = #tpu.dot_dimension_numbers<[1], [0], [0], [1], [0, 0, 1, 1], [], []>} : vector<16x512xbf16>, vector<512x384xbf16>, vector<16x384xf32> -> vector<16x384xf32>
    %13 = arith.addf %2, %12 : vector<16x384xf32>
    %c0_10 = arith.constant 0 : index
    %c512 = arith.constant 512 : index
    %14 = vector.load %arg2[%c0_10, %c512] : memref<384x1536xbf16, #tpu.memory_space<vmem>>, vector<384x512xbf16>
    %cst_11 = arith.constant dense<0.000000e+00> : vector<16x512xf32>
    %15 = tpu.matmul %1, %14, %cst_11 {dimension_numbers = #tpu.dot_dimension_numbers<[1], [0], [0], [1], [0, 0, 1, 1], [], []>} : vector<16x384xbf16>, vector<384x512xbf16>, vector<16x512xf32> -> vector<16x512xf32>
    %c0_12 = arith.constant 0 : index
    %c512_13 = arith.constant 512 : index
    %16 = vector.load %arg3[%c0_12, %c512_13] : memref<1x1536xf32, #tpu.memory_space<vmem>>, vector<1x512xf32>
    %17 = vector.broadcast %16 : vector<1x512xf32> to vector<16x512xf32>
    %18 = arith.addf %15, %17 : vector<16x512xf32>
    %cst_14 = arith.constant 0.000000e+00 : f32
    %19 = vector.broadcast %cst_14 : f32 to vector<16x512xf32>
    %20 = arith.maximumf %18, %19 : vector<16x512xf32>
    %21 = arith.truncf %20 : vector<16x512xf32> to vector<16x512xbf16>
    %c512_15 = arith.constant 512 : index
    %c0_16 = arith.constant 0 : index
    %22 = vector.load %arg4[%c512_15, %c0_16] : memref<1536x384xbf16, #tpu.memory_space<vmem>>, vector<512x384xbf16>
    %cst_17 = arith.constant dense<0.000000e+00> : vector<16x384xf32>
    %23 = tpu.matmul %21, %22, %cst_17 {dimension_numbers = #tpu.dot_dimension_numbers<[1], [0], [0], [1], [0, 0, 1, 1], [], []>} : vector<16x512xbf16>, vector<512x384xbf16>, vector<16x384xf32> -> vector<16x384xf32>
    %24 = arith.addf %13, %23 : vector<16x384xf32>
    %c0_18 = arith.constant 0 : index
    %c1024 = arith.constant 1024 : index
    %25 = vector.load %arg2[%c0_18, %c1024] : memref<384x1536xbf16, #tpu.memory_space<vmem>>, vector<384x512xbf16>
    %cst_19 = arith.constant dense<0.000000e+00> : vector<16x512xf32>
    %26 = tpu.matmul %1, %25, %cst_19 {dimension_numbers = #tpu.dot_dimension_numbers<[1], [0], [0], [1], [0, 0, 1, 1], [], []>} : vector<16x384xbf16>, vector<384x512xbf16>, vector<16x512xf32> -> vector<16x512xf32>
    %c0_20 = arith.constant 0 : index
    %c1024_21 = arith.constant 1024 : index
    %27 = vector.load %arg3[%c0_20, %c1024_21] : memref<1x1536xf32, #tpu.memory_space<vmem>>, vector<1x512xf32>
    %28 = vector.broadcast %27 : vector<1x512xf32> to vector<16x512xf32>
    %29 = arith.addf %26, %28 : vector<16x512xf32>
    %cst_22 = arith.constant 0.000000e+00 : f32
    %30 = vector.broadcast %cst_22 : f32 to vector<16x512xf32>
    %31 = arith.maximumf %29, %30 : vector<16x512xf32>
    %32 = arith.truncf %31 : vector<16x512xf32> to vector<16x512xbf16>
    %c1024_23 = arith.constant 1024 : index
    %c0_24 = arith.constant 0 : index
    %33 = vector.load %arg4[%c1024_23, %c0_24] : memref<1536x384xbf16, #tpu.memory_space<vmem>>, vector<512x384xbf16>
    %cst_25 = arith.constant dense<0.000000e+00> : vector<16x384xf32>
    %34 = tpu.matmul %32, %33, %cst_25 {dimension_numbers = #tpu.dot_dimension_numbers<[1], [0], [0], [1], [0, 0, 1, 1], [], []>} : vector<16x512xbf16>, vector<512x384xbf16>, vector<16x384xf32> -> vector<16x384xf32>
    %35 = arith.addf %24, %34 : vector<16x384xf32>
    %c0_26 = arith.constant 0 : index
    %c0_27 = arith.constant 0 : index
    %36 = vector.load %arg5[%c0_26, %c0_27] : memref<1x384xf32, #tpu.memory_space<vmem>>, vector<1x384xf32>
    %37 = vector.broadcast %36 : vector<1x384xf32> to vector<16x384xf32>
    %38 = arith.addf %35, %37 : vector<16x384xf32>
    %c0_28 = arith.constant 0 : index
    %c0_29 = arith.constant 0 : index
    %39 = vector.load %arg6[%c0_28, %c0_29] : memref<16x384xf32, #tpu.memory_space<vmem>>, vector<16x384xf32>
    tpu.vector_store %arg6[%c0_28, %c0_29], %38 {strides = array<i32>} : memref<16x384xf32, #tpu.memory_space<vmem>>, vector<16x384xf32>,
    return
  }
  func.func @transform_0(%arg0: i32) -> (i32, i32) {
    %c0_i32 = arith.constant 0 : i32
    %c0_i32_0 = arith.constant 0 : i32
    return %arg0, %c0_i32 : i32, i32
  }
  func.func @transform_1(%arg0: i32) -> (i32, i32) {
    %c0_i32 = arith.constant 0 : i32
    %c0_i32_0 = arith.constant 0 : i32
    %c0_i32_1 = arith.constant 0 : i32
    return %c0_i32, %c0_i32_0 : i32, i32
  }
  func.func @transform_2(%arg0: i32) -> (i32, i32) {
    %c0_i32 = arith.constant 0 : i32
    %c0_i32_0 = arith.constant 0 : i32
    %c0_i32_1 = arith.constant 0 : i32
    return %c0_i32, %c0_i32_0 : i32, i32
  }
  func.func @transform_3(%arg0: i32) -> (i32, i32) {
    %c0_i32 = arith.constant 0 : i32
    %c0_i32_0 = arith.constant 0 : i32
    %c0_i32_1 = arith.constant 0 : i32
    return %c0_i32, %c0_i32_0 : i32, i32
  }
  func.func @transform_4(%arg0: i32) -> (i32, i32) {
    %c0_i32 = arith.constant 0 : i32
    %c0_i32_0 = arith.constant 0 : i32
    %c0_i32_1 = arith.constant 0 : i32
    return %c0_i32, %c0_i32_0 : i32, i32
  }
  func.func @transform_5(%arg0: i32) -> (i32, i32) {
    %c0_i32 = arith.constant 0 : i32
    %c0_i32_0 = arith.constant 0 : i32
    return %arg0, %c0_i32 : i32, i32
  }
}

</mosaic_0001>

<bundles_post_ra>
// kernel: tpu_custom_call.1
= control target key start
LH: loop header
LB: loop body
LE: loop exit
PB: predicated region body
PF: predicated region fallthrough
CT: control target
= control target key end

     0   :  { %10 = vsyncpa [#allocation3], 0  ;;  %s6876_s0 = inlined_call_operand.hbm [shape: f32[16,384], index: 0, kind: input, shape index: {}]   ;;  %s6877_s1 = inlined_call_operand.hbm [shape: bf16[384,1536], index: 1, kind: input, shape index: {}]   ;;  %s6878_s2 = inlined_call_operand.hbm [shape: f32[1,1536], index: 2, kind: input, shape index: {}]   ;;  %s6879_s3 = inlined_call_operand.hbm [shape: bf16[1536,384], index: 3, kind: input, shape index: {}]   ;;  %s6880_s4 = inlined_call_operand.hbm [shape: f32[1,384], index: 4, kind: input, shape index: {}]   ;;  %s6881_s5 = inlined_call_operand.hbm [shape: f32[16,384], index: 5, kind: output, shape index: {}]  }
   0x1   :  { %11 = vsyncpa [#allocation6], 0 }
   0x2   :  { %12 = vsyncpa [#allocation9], 0 }
   0x3   :  { %13 = vsyncpa [#allocation4], 0  ;;  %s6664_s18 = smov [#allocation5]   ;;  %s6524_s22 = scalar_lea.hbm %s6877_s1, 36864 }
   0x4   :  { %s31_s19 = sshll.u32 %s6664_s18, 4  ;;  %p6525_p0 = scmp.ne.s32.totalorder %s6877_s1, %s6524_s22  ;;  %s32_s19 = int_to_ptr.vmem [resolvable:$true] %s31_s19 }
   0x5   :  { %p6528_p1 = scmp.lt.u32.totalorder %s6524_s22, %s6877_s1 }
   0x7   :  { %p6530_p2 = pnand %p6528_p1, %p6525_p0 }
   0x9   :  { %6533 = shalt.err (!%p6530_p2)
}
   0xa   :  { %s6534_s27 = scalar_lea.vmem %s32_s19, 36864  ;;  %p6539_p4 = scmp.lt.s32.totalorder %s32_s19, %s32_s19 }
   0xb   :  { %p6535_p3 = scmp.ne.s32.totalorder %s32_s19, %s6534_s27  ;;  %p6540_p5 = scmp.lt.s32.totalorder %s6534_s27, %s6534_s27 }
   0xd   :  { %p6541_p6 = por %p6540_p5, %p6539_p4 }
   0xf   :  { %p6542_p7 = pnand %p6541_p6, %p6535_p3 }
  0x11   :  { %6545 = shalt.err (!%p6542_p7)
}
  0x12   :  { %s6665_s28 = smov 768   ;;  %s6666_s29 = smov 48  }
  0x13   :  { %37 = dma.hbm_to_vmem [thread:$0]  %s6877_s1, 36864, %s32_s19, [#allocation6], %s6665_s28, %s6665_s28, %s6666_s29  }
  0x14   :  { %s6667_s7 = smov [#allocation8]   ;;  %s6546_s11 = scalar_lea.hbm %s6879_s3, 36864 }
  0x15   :  { %s53_s8 = sshll.u32 %s6667_s7, 4  ;;  %p6547_p8 = scmp.ne.s32.totalorder %s6879_s3, %s6546_s11  ;;  %s54_s8 = int_to_ptr.vmem [resolvable:$true] %s53_s8 }
  0x16   :  { %p6550_p9 = scmp.lt.u32.totalorder %s6546_s11, %s6879_s3 }
  0x18   :  { %p6552_p10 = pnand %p6550_p9, %p6547_p8 }
  0x1a   :  { %6555 = shalt.err (!%p6552_p10)
}
  0x1b   :  { %s6556_s16 = scalar_lea.vmem %s54_s8, 36864  ;;  %p6561_p12 = scmp.lt.s32.totalorder %s54_s8, %s54_s8 }
  0x1c   :  { %p6557_p11 = scmp.ne.s32.totalorder %s54_s8, %s6556_s16  ;;  %p6562_p13 = scmp.lt.s32.totalorder %s6556_s16, %s6556_s16 }
  0x1e   :  { %p6563_p0 = por %p6562_p13, %p6561_p12 }
  0x20   :  { %p6564_p1 = pnand %p6563_p0, %p6557_p11 }
  0x22   :  { %6567 = shalt.err (!%p6564_p1)
}
  0x23   :  { %s6668_s1 = smov 192   ;;  %s6669_s17 = smov 12  }
  0x24   :  { %59 = dma.hbm_to_vmem [thread:$0]  %s6879_s3, 36864, %s54_s8, [#allocation9], %s6668_s1, %s6668_s1, %s6669_s17  }
  0x25   :  { %s6670_s20 = smov [#allocation2]   ;;  %s6568_s24 = scalar_lea.hbm %s6876_s0, 768 }
  0x26   :  { %s19_s21 = sshll.u32 %s6670_s20, 4  ;;  %p6569_p2 = scmp.ne.s32.totalorder %s6876_s0, %s6568_s24  ;;  %s20_s21 = int_to_ptr.vmem [resolvable:$true] %s19_s21 }
  0x27   :  { %p6572_p3 = scmp.lt.u32.totalorder %s6568_s24, %s6876_s0 }
  0x29   :  { %p6574_p4 = pnand %p6572_p3, %p6569_p2 }
  0x2b   :  { %6577 = shalt.err (!%p6574_p4)
}
  0x2c   :  { %s6578_s29 = scalar_lea.vmem %s20_s21, 768  ;;  %p6583_p6 = scmp.lt.s32.totalorder %s20_s21, %s20_s21 }
  0x2d   :  { %p6579_p5 = scmp.ne.s32.totalorder %s20_s21, %s6578_s29  ;;  %p6584_p7 = scmp.lt.s32.totalorder %s6578_s29, %s6578_s29 }
  0x2f   :  { %p6585_p8 = por %p6584_p7, %p6583_p6 }
  0x31   :  { %p6586_p9 = pnand %p6585_p8, %p6579_p5 }
  0x33   :  { %6589 = shalt.err (!%p6586_p9)
}
  0x34   :  { %s6671_s3 = smov 384   ;;  %s6672_s30 = smov 24  }
  0x35   :  { %25 = dma.hbm_to_vmem [thread:$0]  %s6876_s0, 768, %s20_s21, [#allocation3], %s6671_s3, %s6671_s3, %s6672_s30  }
  0x36   :  { %s6673_s8 = smov [#allocation7]   ;;  %s6674_s10 = smov [#allocation10]  }
  0x37   :  { %s44_s9 = sshll.u32 %s6673_s8, 4  ;;  %s66_s11 = sshll.u32 %s6674_s10, 4  ;;  %s45_s9 = int_to_ptr.vmem [resolvable:$true] %s44_s9  ;;  %s67_s11 = int_to_ptr.vmem [resolvable:$true] %s66_s11 }
  0x38   :  { %s6590_s14 = scalar_lea.hbm %s6878_s2, 192 }
  0x39   :  { %p6591_p10 = scmp.ne.s32.totalorder %s6878_s2, %s6590_s14  ;;  %p6594_p11 = scmp.lt.u32.totalorder %s6590_s14, %s6878_s2 }
  0x3b   :  { %p6596_p12 = pnand %p6594_p11, %p6591_p10 }
  0x3d   :  { %6599 = shalt.err (!%p6596_p12)
}
  0x3e   :  { %s6600_s0 = scalar_lea.vmem %s45_s9, 192  ;;  %p6605_p0 = scmp.lt.s32.totalorder %s45_s9, %s45_s9 }
  0x3f   :  { %p6601_p13 = scmp.ne.s32.totalorder %s45_s9, %s6600_s0  ;;  %p6606_p1 = scmp.lt.s32.totalorder %s6600_s0, %s6600_s0 }
  0x41   :  { %p6607_p2 = por %p6606_p1, %p6605_p0 }
  0x43   :  { %p6608_p3 = pnand %p6607_p2, %p6601_p13 }
  0x45   :  { %6611 = shalt.err (!%p6608_p3)
}
  0x46   :  { %47 = dma.hbm_to_vmem [thread:$0]  %s6878_s2, 192, %s45_s9, [#allocation6]  }
  0x47   :  { %s6612_s22 = scalar_lea.hbm %s6880_s4, 48 }
  0x48   :  { %p6613_p4 = scmp.ne.s32.totalorder %s6880_s4, %s6612_s22  ;;  %p6616_p5 = scmp.lt.u32.totalorder %s6612_s22, %s6880_s4 }
  0x4a   :  { %p6618_p6 = pnand %p6616_p5, %p6613_p4 }
  0x4c   :  { %6621 = shalt.err (!%p6618_p6)
}
  0x4d   :  { %s6622_s27 = scalar_lea.vmem %s67_s11, 48  ;;  %s6626_s28 = scalar_lea.vmem %s67_s11, 64 }
  0x4e   :  { %p6623_p7 = scmp.ne.s32.totalorder %s67_s11, %s6622_s27  ;;  %p6627_p8 = scmp.lt.s32.totalorder %s67_s11, %s67_s11 }
  0x4f   :  { %p6628_p9 = scmp.lt.s32.totalorder %s6626_s28, %s6622_s27 }
  0x51   :  { %p6629_p10 = por %p6628_p9, %p6627_p8 }
  0x53   :  { %p6630_p11 = pnand %p6629_p10, %p6623_p7 }
  0x55   :  { %6633 = shalt.err (!%p6630_p11)
}
  0x56   :  { %69 = dma.hbm_to_vmem [thread:$0]  %s6880_s4, 48, %s67_s11, [#allocation9]  }
  0x57   :  { %6656 = dma.done.wait [#allocation3], 768  }
  0x58   :  { %6657 = vsyncadd [#allocation3], 4294966528 }
  0x59   :  { %6658 = dma.done.wait [#allocation6], 37056  }
  0x5a   :  { %6659 = vsyncadd [#allocation6], 4294930240 }
  0x5b   :  { %6660 = dma.done.wait [#allocation9], 36912  }
  0x5c   :  { %6661 = vsyncadd [#allocation9], 4294930384  ;;  %v5708_v0 = vld [vmem:[#allocation5 + $0x4] ss:$48 sps:$4 sm:$0xff]   ;;  %v5710_v1 = vld [vmem:[#allocation5 + $0xc] ss:$48 sps:$4 sm:$0xff]  }
  0x5d   :  { %693 = vmatprep.subr.bf16.mxu0 %v5708_v0  ;;  %v5712_v2 = vld [vmem:[#allocation5] ss:$48 sps:$4 sm:$0xff]   ;;  %v5713_v3 = vld [vmem:[#allocation5 + $0x8] ss:$48 sps:$4 sm:$0xff]   ;;  %779 = vmatprep.subr.bf16.mxu1 %v5710_v1  ;;  %v5714_v4 = vld [vmem:[#allocation5 + $0x64] ss:$48 sps:$4 sm:$0xff]  }
  0x5e   :  { %694 = vmatpush1.bf16.msra.mxu0 %v5712_v2  ;;  %780 = vmatpush1.bf16.msra.mxu1 %v5713_v3  ;;  %v5716_v5 = vld [vmem:[#allocation5 + $0x6c] ss:$48 sps:$4 sm:$0xff]   ;;  %v5718_v6 = vld [vmem:[#allocation5 + $0x60] ss:$48 sps:$4 sm:$0xff]   ;;  %v5719_v7 = vld [vmem:[#allocation5 + $0x68] ss:$48 sps:$4 sm:$0xff]  }
  0x5f   :  { %695 = vmatprep.subr.bf16.mxu0 %v5714_v4  ;;  %781 = vmatprep.subr.bf16.mxu1 %v5716_v5  ;;  %v5720_v8 = vld [vmem:[#allocation5 + $0xc4] ss:$48 sps:$4 sm:$0xff]   ;;  %v5722_v9 = vld [vmem:[#allocation5 + $0xcc] ss:$48 sps:$4 sm:$0xff]   ;;  %v5724_v10 = vld [vmem:[#allocation5 + $0xc0] ss:$48 sps:$4 sm:$0xff]  }
  0x60   :  { %v5725_v11 = vld [vmem:[#allocation5 + $0xc8] ss:$48 sps:$4 sm:$0xff]   ;;  %v5726_v12 = vld [vmem:[#allocation5 + $0x124] ss:$48 sps:$4 sm:$0xff]   ;;  %v5728_v13 = vld [vmem:[#allocation5 + $0x12c] ss:$48 sps:$4 sm:$0xff]  }
  0x61   :  { %v5730_v14 = vld [vmem:[#allocation5 + $0x120] ss:$48 sps:$4 sm:$0xff]   ;;  %v5731_v15 = vld [vmem:[#allocation5 + $0x128] ss:$48 sps:$4 sm:$0xff]   ;;  %v5732_v16 = vld [vmem:[#allocation5 + $0x184] ss:$48 sps:$4 sm:$0xff]  }
  0x62   :  { %696 = vmatpush1.bf16.msra.mxu0 %v5718_v6  ;;  %782 = vmatpush1.bf16.msra.mxu1 %v5719_v7  ;;  %v5734_v17 = vld [vmem:[#allocation5 + $0x18c] ss:$48 sps:$4 sm:$0xff]   ;;  %v5736_v18 = vld [vmem:[#allocation5 + $0x180] ss:$48 sps:$4 sm:$0xff]   ;;  %v5737_v19 = vld [vmem:[#allocation5 + $0x188] ss:$48 sps:$4 sm:$0xff]  }
  0x63   :  { %697 = vmatprep.subr.bf16.mxu0 %v5720_v8  ;;  %783 = vmatprep.subr.bf16.mxu1 %v5722_v9  ;;  %v5738_v20 = vld [vmem:[#allocation5 + $0x1e4] ss:$48 sps:$4 sm:$0xff]   ;;  %v5740_v21 = vld [vmem:[#allocation5 + $0x1ec] ss:$48 sps:$4 sm:$0xff]   ;;  %v5742_v22 = vld [vmem:[#allocation5 + $0x1e0] ss:$48 sps:$4 sm:$0xff]  }
  0x64   :  { %v5743_v23 = vld [vmem:[#allocation5 + $0x1e8] ss:$48 sps:$4 sm:$0xff]   ;;  %v5744_v24 = vld [vmem:[#allocation5 + $0x244] ss:$48 sps:$4 sm:$0xff]   ;;  %v5746_v25 = vld [vmem:[#allocation5 + $0x24c] ss:$48 sps:$4 sm:$0xff]  }
  0x65   :  { %v5748_v26 = vld [vmem:[#allocation5 + $0x240] ss:$48 sps:$4 sm:$0xff]   ;;  %v5749_v27 = vld [vmem:[#allocation5 + $0x248] ss:$48 sps:$4 sm:$0xff]   ;;  %v5750_v28 = vld [vmem:[#allocation5 + $0x2a4] ss:$48 sps:$4 sm:$0xff]  }
  0x66   :  { %698 = vmatpush1.bf16.msra.mxu0 %v5724_v10  ;;  %784 = vmatpush1.bf16.msra.mxu1 %v5725_v11  ;;  %v5752_v29 = vld [vmem:[#allocation5 + $0x2ac] ss:$48 sps:$4 sm:$0xff]   ;;  %v5754_v30 = vld [vmem:[#allocation5 + $0x2a0] ss:$48 sps:$4 sm:$0xff]   ;;  %v5755_v31 = vld [vmem:[#allocation5 + $0x2a8] ss:$48 sps:$4 sm:$0xff]  }
  0x67   :  { %699 = vmatprep.subr.bf16.mxu0 %v5726_v12  ;;  %785 = vmatprep.subr.bf16.mxu1 %v5728_v13  ;;  %v5756_v32 = vld [vmem:[#allocation5 + $0x304] ss:$48 sps:$4 sm:$0xff]   ;;  %v5758_v33 = vld [vmem:[#allocation5 + $0x30c] ss:$48 sps:$4 sm:$0xff]   ;;  %v5760_v34 = vld [vmem:[#allocation5 + $0x300] ss:$48 sps:$4 sm:$0xff]  }
  0x68   :  { %v5761_v35 = vld [vmem:[#allocation5 + $0x308] ss:$48 sps:$4 sm:$0xff]   ;;  %v5762_v36 = vld [vmem:[#allocation5 + $0x364] ss:$48 sps:$4 sm:$0xff]   ;;  %v5764_v37 = vld [vmem:[#allocation5 + $0x36c] ss:$48 sps:$4 sm:$0xff]  }
  0x69   :  { %v5766_v38 = vld [vmem:[#allocation5 + $0x360] ss:$48 sps:$4 sm:$0xff]   ;;  %v5767_v39 = vld [vmem:[#allocation5 + $0x368] ss:$48 sps:$4 sm:$0xff]   ;;  %v5768_v40 = vld [vmem:[#allocation5 + $0x3c4] ss:$48 sps:$4 sm:$0xff]  }
  0x6a   :  { %700 = vmatpush1.bf16.msra.mxu0 %v5730_v14  ;;  %786 = vmatpush1.bf16.msra.mxu1 %v5731_v15  ;;  %v5770_v41 = vld [vmem:[#allocation5 + $0x3cc] ss:$48 sps:$4 sm:$0xff]   ;;  %v5772_v42 = vld [vmem:[#allocation5 + $0x3c0] ss:$48 sps:$4 sm:$0xff]   ;;  %v5773_v43 = vld [vmem:[#allocation5 + $0x3c8] ss:$48 sps:$4 sm:$0xff]  }
  0x6b   :  { %701 = vmatprep.subr.bf16.mxu0 %v5732_v16  ;;  %787 = vmatprep.subr.bf16.mxu1 %v5734_v17  ;;  %v5774_v44 = vld [vmem:[#allocation5 + $0x424] ss:$48 sps:$4 sm:$0xff]   ;;  %v5776_v45 = vld [vmem:[#allocation5 + $0x42c] ss:$48 sps:$4 sm:$0xff]   ;;  %v5778_v48 = vld [vmem:[#allocation5 + $0x420] ss:$48 sps:$4 sm:$0xff]  }
  0x6c   :  { %v87_v46 = vld [vmem:[#allocation2 + $0x8] sm:$0xff]  ;;  %v90_v47 = vld [vmem:[#allocation2 + $0x20] sm:$0xff]  ;;  %v89_v5 = vld [vmem:[#allocation2 + $0x18] sm:$0xff]  ;;  %v6675_v16 = vmov 0   ;;  %s6676_s4 = smov [#allocation11]  }
  0x6d   :  { %v5779_v49 = vld [vmem:[#allocation5 + $0x428] ss:$48 sps:$4 sm:$0xff]   ;;  %v6770_v50 = vpack.c.bf16 %v90_v47, %v87_v46  ;;  %v5780_v51 = vld [vmem:[#allocation5 + $0x484] ss:$48 sps:$4 sm:$0xff]   ;;  %v5782_v52 = vld [vmem:[#allocation5 + $0x48c] ss:$48 sps:$4 sm:$0xff]  }
  0x6e   :  { %702 = vmatpush1.bf16.msra.mxu0 %v5736_v18  ;;  %788 = vmatpush1.bf16.msra.mxu1 %v5737_v19  ;;  %v5784_v53 = vld [vmem:[#allocation5 + $0x480] ss:$48 sps:$4 sm:$0xff]   ;;  %v5785_v54 = vld [vmem:[#allocation5 + $0x488] ss:$48 sps:$4 sm:$0xff]   ;;  %v5786_v55 = vld [vmem:[#allocation5 + $0x4e4] ss:$48 sps:$4 sm:$0xff]  }
  0x6f   :  { %703 = vmatprep.subr.bf16.mxu0 %v5738_v20  ;;  %789 = vmatprep.subr.bf16.mxu1 %v5740_v21  ;;  %v5788_v56 = vld [vmem:[#allocation5 + $0x4ec] ss:$48 sps:$4 sm:$0xff]   ;;  %v5790_v57 = vld [vmem:[#allocation5 + $0x4e0] ss:$48 sps:$4 sm:$0xff]   ;;  %v5791_v58 = vld [vmem:[#allocation5 + $0x4e8] ss:$48 sps:$4 sm:$0xff]  }
  0x70   :  { %725 = vmatprep.mubr.bf16.mxu0 %v6770_v50  ;;  %811 = vmatprep.mubr.bf16.mxu1 %v6770_v50  ;;  %v5792_v59 = vld [vmem:[#allocation5 + $0x544] ss:$48 sps:$4 sm:$0xff]   ;;  %v5794_v60 = vld [vmem:[#allocation5 + $0x54c] ss:$48 sps:$4 sm:$0xff]   ;;  %v5796_v61 = vld [vmem:[#allocation5 + $0x540] ss:$48 sps:$4 sm:$0xff]  }
  0x71   :  { %v5797_v62 = vld [vmem:[#allocation5 + $0x548] ss:$48 sps:$4 sm:$0xff]   ;;  %v5798_v63 = vld [vmem:[#allocation5 + $0x5a4] ss:$48 sps:$4 sm:$0xff]   ;;  %v5800_v0 = vld [vmem:[#allocation5 + $0x5ac] ss:$48 sps:$4 sm:$0xff]  }
  0x72   :  { %704 = vmatpush1.bf16.msra.mxu0 %v5742_v22  ;;  %790 = vmatpush1.bf16.msra.mxu1 %v5743_v23  ;;  %v5802_v1 = vld [vmem:[#allocation5 + $0x5a0] ss:$48 sps:$4 sm:$0xff]   ;;  %v5803_v2 = vld [vmem:[#allocation5 + $0x5a8] ss:$48 sps:$4 sm:$0xff]   ;;  %v5806_v3 = vld [vmem:[#allocation5 + $0x604] ss:$48 sps:$4 sm:$0xff]  }
  0x73   :  { %705 = vmatprep.subr.bf16.mxu0 %v5744_v24  ;;  %791 = vmatprep.subr.bf16.mxu1 %v5746_v25  ;;  %v86_v4 = vld [vmem:[#allocation2] sm:$0xff]  ;;  %v5809_v6 = vld [vmem:[#allocation5 + $0x60c] ss:$48 sps:$4 sm:$0xff]   ;;  %v5807_v9 = vld [vmem:[#allocation5 + $0x608] ss:$48 sps:$4 sm:$0xff]   ;;  %s4905_s6 = sshll.u32 %s6676_s4, 4  ;;  %s4906_s6 = int_to_ptr.vmem [resolvable:$true] %s4905_s6 }
  0x74   :  { %v5804_v7 = vld [vmem:[#allocation5 + $0x600] ss:$48 sps:$4 sm:$0xff]   ;;  %v6774_v8 = vpack.c.bf16 %v89_v5, %v86_v4  ;;  %v5812_v10 = vld [vmem:[#allocation5 + $0x664] ss:$48 sps:$4 sm:$0xff]   ;;  %v5815_v11 = vld [vmem:[#allocation5 + $0x66c] ss:$48 sps:$4 sm:$0xff]   ;;  %p6639_p13 = scmp.lt.s32.totalorder %s4906_s6, %s4906_s6 }
  0x75   :  { %v5810_v12 = vld [vmem:[#allocation5 + $0x660] ss:$48 sps:$4 sm:$0xff]   ;;  %v5813_v13 = vld [vmem:[#allocation5 + $0x668] ss:$48 sps:$4 sm:$0xff]   ;;  %v5818_v14 = vld [vmem:[#allocation5 + $0x6c4] ss:$48 sps:$4 sm:$0xff]  }
  0x76   :  { %706 = vmatpush1.bf16.msra.mxu0 %v5748_v26  ;;  %792 = vmatpush1.bf16.msra.mxu1 %v5749_v27  ;;  %v5821_v15 = vld [vmem:[#allocation5 + $0x6cc] ss:$48 sps:$4 sm:$0xff]   ;;  %v5816_v17 = vld [vmem:[#allocation5 + $0x6c0] ss:$48 sps:$4 sm:$0xff]   ;;  %v5819_v18 = vld [vmem:[#allocation5 + $0x6c8] ss:$48 sps:$4 sm:$0xff]  }
  0x77   :  { %707 = vmatprep.subr.bf16.mxu0 %v5750_v28  ;;  %793 = vmatprep.subr.bf16.mxu1 %v5752_v29  ;;  %v5824_v19 = vld [vmem:[#allocation5 + $0x724] ss:$48 sps:$4 sm:$0xff]   ;;  %v5827_v20 = vld [vmem:[#allocation5 + $0x72c] ss:$48 sps:$4 sm:$0xff]   ;;  %v5822_v21 = vld [vmem:[#allocation5 + $0x720] ss:$48 sps:$4 sm:$0xff]  }
  0x78   :  { %v5825_v22 = vld [vmem:[#allocation5 + $0x728] ss:$48 sps:$4 sm:$0xff]   ;;  %v5830_v23 = vld [vmem:[#allocation5 + $0x784] ss:$48 sps:$4 sm:$0xff]   ;;  %v5833_v24 = vld [vmem:[#allocation5 + $0x78c] ss:$48 sps:$4 sm:$0xff]  }
  0x79   :  { %v5828_v25 = vld [vmem:[#allocation5 + $0x780] ss:$48 sps:$4 sm:$0xff]   ;;  %v5831_v26 = vld [vmem:[#allocation5 + $0x788] ss:$48 sps:$4 sm:$0xff]   ;;  %v5836_v27 = vld [vmem:[#allocation5 + $0x7e4] ss:$48 sps:$4 sm:$0xff]  }
  0x7a   :  { %708 = vmatpush1.bf16.msra.mxu0 %v5754_v30  ;;  %794 = vmatpush1.bf16.msra.mxu1 %v5755_v31  ;;  %v5839_v28 = vld [vmem:[#allocation5 + $0x7ec] ss:$48 sps:$4 sm:$0xff]   ;;  %v5834_v29 = vld [vmem:[#allocation5 + $0x7e0] ss:$48 sps:$4 sm:$0xff]   ;;  %v5837_v30 = vld [vmem:[#allocation5 + $0x7e8] ss:$48 sps:$4 sm:$0xff]  }
  0x7b   :  { %709 = vmatprep.subr.bf16.mxu0 %v5756_v32  ;;  %795 = vmatprep.subr.bf16.mxu1 %v5758_v33  ;;  %v5842_v31 = vld [vmem:[#allocation5 + $0x844] ss:$48 sps:$4 sm:$0xff]   ;;  %v5845_v32 = vld [vmem:[#allocation5 + $0x84c] ss:$48 sps:$4 sm:$0xff]   ;;  %v5840_v33 = vld [vmem:[#allocation5 + $0x840] ss:$48 sps:$4 sm:$0xff]  }
  0x7c   :  { %v5860_v46 = vld [vmem:[#allocation5 + $0x74] ss:$48 sps:$4 sm:$0xff]   ;;  %v5863_v47 = vld [vmem:[#allocation5 + $0x7c] ss:$48 sps:$4 sm:$0xff]   ;;  %v5888_v5 = vld [vmem:[#allocation5 + $0x250] ss:$48 sps:$4 sm:$0xff]  }
  0x7d   :  { %v5893_v4 = vld [vmem:[#allocation5 + $0x25c] ss:$48 sps:$4 sm:$0xff]   ;;  %s6634_s7 = scalar_lea.vmem %s4906_s6, 768 }
  0x7e   :  { %710 = vmatpush1.bf16.msra.mxu0 %v5760_v34  ;;  %796 = vmatpush1.bf16.msra.mxu1 %v5761_v35  ;;  %v5843_v34 = vld [vmem:[#allocation5 + $0x848] ss:$48 sps:$4 sm:$0xff]   ;;  %v5848_v35 = vld [vmem:[#allocation5 + $0x8a4] ss:$48 sps:$4 sm:$0xff]   ;;  %p6635_p12 = scmp.ne.s32.totalorder %s4906_s6, %s6634_s7  ;;  %p6640_p0 = scmp.lt.s32.totalorder %s6634_s7, %s6634_s7 }
  0x7f   :  { %711 = vmatprep.subr.bf16.mxu0 %v5762_v36  ;;  %797 = vmatprep.subr.bf16.mxu1 %v5764_v37  ;;  %v5851_v36 = vld [vmem:[#allocation5 + $0x8ac] ss:$48 sps:$4 sm:$0xff]   ;;  %v5846_v37 = vld [vmem:[#allocation5 + $0x8a0] ss:$48 sps:$4 sm:$0xff]  }
  0x80   :  { %p6641_p1 = por %p6640_p0, %p6639_p13 }
  0x82   :  { %712 = vmatpush1.bf16.msra.mxu0 %v5766_v38  ;;  %798 = vmatpush1.bf16.msra.mxu1 %v5767_v39  ;;  %v5849_v38 = vld [vmem:[#allocation5 + $0x8a8] ss:$48 sps:$4 sm:$0xff]   ;;  %v88_v39 = vld [vmem:[#allocation2 + $0x10] sm:$0xff]  ;;  %p6642_p2 = pnand %p6641_p1, %p6635_p12 }
  0x83   :  { %713 = vmatprep.subr.bf16.mxu0 %v5768_v40  ;;  %799 = vmatprep.subr.bf16.mxu1 %v5770_v41  ;;  %v91_v40 = vld [vmem:[#allocation2 + $0x28] sm:$0xff]  ;;  %v5854_v41 = vld [vmem:[#allocation5 + $0x14] ss:$48 sps:$4 sm:$0xff]  }
  0x86   :  { %714 = vmatpush1.bf16.msra.mxu0 %v5772_v42  ;;  %800 = vmatpush1.bf16.msra.mxu1 %v5773_v43  ;;  %v5857_v42 = vld [vmem:[#allocation5 + $0x1c] ss:$48 sps:$4 sm:$0xff]   ;;  %v6780_v43 = vpack.c.bf16 %v91_v40, %v88_v39  ;;  %v5936_v39 = vld [vmem:[#allocation5 + $0x550] ss:$48 sps:$4 sm:$0xff]   ;;  %v5939_v40 = vld [vmem:[#allocation5 + $0x558] ss:$48 sps:$4 sm:$0xff]  }
  0x87   :  { %715 = vmatprep.subr.bf16.mxu0 %v5774_v44  ;;  %801 = vmatprep.subr.bf16.mxu1 %v5776_v45  ;;  %v5852_v44 = vld [vmem:[#allocation5 + $0x10] ss:$48 sps:$4 sm:$0xff]   ;;  %v5855_v45 = vld [vmem:[#allocation5 + $0x18] ss:$48 sps:$4 sm:$0xff]  }
  0x8a   :  { %716 = vmatpush1.bf16.msra.mxu0 %v5778_v48  ;;  %802 = vmatpush1.bf16.msra.mxu1 %v5779_v49  ;;  %v5858_v48 = vld [vmem:[#allocation5 + $0x70] ss:$48 sps:$4 sm:$0xff]   ;;  %v5861_v49 = vld [vmem:[#allocation5 + $0x78] ss:$48 sps:$4 sm:$0xff]  }
  0x8b   :  { %717 = vmatprep.subr.bf16.mxu0 %v5780_v51  ;;  %803 = vmatprep.subr.bf16.mxu1 %v5782_v52  ;;  %v5866_v51 = vld [vmem:[#allocation5 + $0xd4] ss:$48 sps:$4 sm:$0xff]   ;;  %v5869_v52 = vld [vmem:[#allocation5 + $0xdc] ss:$48 sps:$4 sm:$0xff]  }
  0x8e   :  { %718 = vmatpush1.bf16.msra.mxu0 %v5784_v53  ;;  %804 = vmatpush1.bf16.msra.mxu1 %v5785_v54  ;;  %v5864_v53 = vld [vmem:[#allocation5 + $0xd0] ss:$48 sps:$4 sm:$0xff]   ;;  %v5867_v54 = vld [vmem:[#allocation5 + $0xd8] ss:$48 sps:$4 sm:$0xff]  }
  0x8f   :  { %719 = vmatprep.subr.bf16.mxu0 %v5786_v55  ;;  %805 = vmatprep.subr.bf16.mxu1 %v5788_v56  ;;  %v5872_v55 = vld [vmem:[#allocation5 + $0x134] ss:$48 sps:$4 sm:$0xff]   ;;  %v5875_v56 = vld [vmem:[#allocation5 + $0x13c] ss:$48 sps:$4 sm:$0xff]  }
  0x92   :  { %720 = vmatpush1.bf16.msra.mxu0 %v5790_v57  ;;  %806 = vmatpush1.bf16.msra.mxu1 %v5791_v58  ;;  %v5870_v57 = vld [vmem:[#allocation5 + $0x130] ss:$48 sps:$4 sm:$0xff]   ;;  %v5873_v58 = vld [vmem:[#allocation5 + $0x138] ss:$48 sps:$4 sm:$0xff]  }
  0x93   :  { %721 = vmatprep.subr.bf16.mxu0 %v5792_v59  ;;  %807 = vmatprep.subr.bf16.mxu1 %v5794_v60  ;;  %v5878_v59 = vld [vmem:[#allocation5 + $0x194] ss:$48 sps:$4 sm:$0xff]   ;;  %v5881_v60 = vld [vmem:[#allocation5 + $0x19c] ss:$48 sps:$4 sm:$0xff]  }
  0x96   :  { %722 = vmatpush1.bf16.msra.mxu0 %v5796_v61  ;;  %808 = vmatpush1.bf16.msra.mxu1 %v5797_v62  ;;  %v5876_v61 = vld [vmem:[#allocation5 + $0x190] ss:$48 sps:$4 sm:$0xff]   ;;  %v5879_v62 = vld [vmem:[#allocation5 + $0x198] ss:$48 sps:$4 sm:$0xff]  }
  0x97   :  { %723 = vmatprep.subr.bf16.mxu0 %v5798_v63  ;;  %809 = vmatprep.subr.bf16.mxu1 %v5800_v0  ;;  %v5884_v63 = vld [vmem:[#allocation5 + $0x1f4] ss:$48 sps:$4 sm:$0xff]   ;;  %v5887_v0 = vld [vmem:[#allocation5 + $0x1fc] ss:$48 sps:$4 sm:$0xff]  }
  0x9a   :  { %724 = vmatpush1.bf16.msra.mxu0 %v5802_v1  ;;  %810 = vmatpush1.bf16.msra.mxu1 %v5803_v2  ;;  %v5882_v1 = vld [vmem:[#allocation5 + $0x1f0] ss:$48 sps:$4 sm:$0xff]   ;;  %v5885_v2 = vld [vmem:[#allocation5 + $0x1f8] ss:$48 sps:$4 sm:$0xff]  }
  0x9b   :  { %736 = vmatprep.subr.bf16.mxu0 %v5806_v3  ;;  %822 = vmatprep.subr.bf16.mxu1 %v5809_v6  ;;  %v5890_v3 = vld [vmem:[#allocation5 + $0x254] ss:$48 sps:$4 sm:$0xff]   ;;  %v5891_v6 = vld [vmem:[#allocation5 + $0x258] ss:$48 sps:$4 sm:$0xff]  }
  0x9d   :  { %726 = vmatmul.mubr.bf16.vlgmr.msra.gmra.mrb[0].mxu0 %v6774_v8  ;;  %812 = vmatmul.mubr.bf16.vlgmr.msra.gmra.mrb[0].mxu1 %v6774_v8 }
  0x9e   :  { %737 = vmatpush1.bf16.msra.mxu0 %v5804_v7  ;;  %823 = vmatpush1.bf16.msra.mxu1 %v5807_v9  ;;  %v5896_v7 = vld [vmem:[#allocation5 + $0x2b4] ss:$48 sps:$4 sm:$0xff]   ;;  %v5899_v9 = vld [vmem:[#allocation5 + $0x2bc] ss:$48 sps:$4 sm:$0xff]  }
  0x9f   :  { %738 = vmatprep.subr.bf16.mxu0 %v5812_v10  ;;  %824 = vmatprep.subr.bf16.mxu1 %v5815_v11  ;;  %v5894_v10 = vld [vmem:[#allocation5 + $0x2b0] ss:$48 sps:$4 sm:$0xff]   ;;  %v5897_v11 = vld [vmem:[#allocation5 + $0x2b8] ss:$48 sps:$4 sm:$0xff]  }
  0xa0   :  { %768 = vmatprep.mubr.bf16.mxu0 %v6675_v16  ;;  %854 = vmatprep.mubr.bf16.mxu1 %v6675_v16 }
  0xa2   :  { %739 = vmatpush1.bf16.msra.mxu0 %v5810_v12  ;;  %825 = vmatpush1.bf16.msra.mxu1 %v5813_v13  ;;  %v5902_v12 = vld [vmem:[#allocation5 + $0x314] ss:$48 sps:$4 sm:$0xff]   ;;  %v5905_v13 = vld [vmem:[#allocation5 + $0x31c] ss:$48 sps:$4 sm:$0xff]  }
  0xa3   :  { %740 = vmatprep.subr.bf16.mxu0 %v5818_v14  ;;  %826 = vmatprep.subr.bf16.mxu1 %v5821_v15  ;;  %v5900_v14 = vld [vmem:[#allocation5 + $0x310] ss:$48 sps:$4 sm:$0xff]   ;;  %v5903_v15 = vld [vmem:[#allocation5 + $0x318] ss:$48 sps:$4 sm:$0xff]  }
  0xa6   :  { %741 = vmatpush1.bf16.msra.mxu0 %v5816_v17  ;;  %827 = vmatpush1.bf16.msra.mxu1 %v5819_v18  ;;  %v5908_v17 = vld [vmem:[#allocation5 + $0x374] ss:$48 sps:$4 sm:$0xff]   ;;  %v5911_v18 = vld [vmem:[#allocation5 + $0x37c] ss:$48 sps:$4 sm:$0xff]  }
  0xa7   :  { %742 = vmatprep.subr.bf16.mxu0 %v5824_v19  ;;  %828 = vmatprep.subr.bf16.mxu1 %v5827_v20  ;;  %v5906_v19 = vld [vmem:[#allocation5 + $0x370] ss:$48 sps:$4 sm:$0xff]   ;;  %v5909_v20 = vld [vmem:[#allocation5 + $0x378] ss:$48 sps:$4 sm:$0xff]  }
  0xaa   :  { %743 = vmatpush1.bf16.msra.mxu0 %v5822_v21  ;;  %829 = vmatpush1.bf16.msra.mxu1 %v5825_v22  ;;  %v5914_v21 = vld [vmem:[#allocation5 + $0x3d4] ss:$48 sps:$4 sm:$0xff]   ;;  %v5917_v22 = vld [vmem:[#allocation5 + $0x3dc] ss:$48 sps:$4 sm:$0xff]  }
  0xab   :  { %744 = vmatprep.subr.bf16.mxu0 %v5830_v23  ;;  %830 = vmatprep.subr.bf16.mxu1 %v5833_v24  ;;  %v5912_v23 = vld [vmem:[#allocation5 + $0x3d0] ss:$48 sps:$4 sm:$0xff]   ;;  %v5915_v24 = vld [vmem:[#allocation5 + $0x3d8] ss:$48 sps:$4 sm:$0xff]  }
  0xae   :  { %745 = vmatpush1.bf16.msra.mxu0 %v5828_v25  ;;  %831 = vmatpush1.bf16.msra.mxu1 %v5831_v26  ;;  %v5920_v25 = vld [vmem:[#allocation5 + $0x434] ss:$48 sps:$4 sm:$0xff]   ;;  %v5923_v26 = vld [vmem:[#allocation5 + $0x43c] ss:$48 sps:$4 sm:$0xff]  }
  0xaf   :  { %746 = vmatprep.subr.bf16.mxu0 %v5836_v27  ;;  %832 = vmatprep.subr.bf16.mxu1 %v5839_v28  ;;  %v5918_v27 = vld [vmem:[#allocation5 + $0x430] ss:$48 sps:$4 sm:$0xff]   ;;  %v5921_v28 = vld [vmem:[#allocation5 + $0x438] ss:$48 sps:$4 sm:$0xff]  }
  0xb2   :  { %747 = vmatpush1.bf16.msra.mxu0 %v5834_v29  ;;  %833 = vmatpush1.bf16.msra.mxu1 %v5837_v30  ;;  %v5926_v29 = vld [vmem:[#allocation5 + $0x494] ss:$48 sps:$4 sm:$0xff]   ;;  %v5929_v30 = vld [vmem:[#allocation5 + $0x49c] ss:$48 sps:$4 sm:$0xff]  }
  0xb3   :  { %748 = vmatprep.subr.bf16.mxu0 %v5842_v31  ;;  %834 = vmatprep.subr.bf16.mxu1 %v5845_v32  ;;  %v5924_v31 = vld [vmem:[#allocation5 + $0x490] ss:$48 sps:$4 sm:$0xff]   ;;  %v5927_v32 = vld [vmem:[#allocation5 + $0x498] ss:$48 sps:$4 sm:$0xff]  }
  0xb6   :  { %749 = vmatpush1.bf16.msra.mxu0 %v5840_v33  ;;  %835 = vmatpush1.bf16.msra.mxu1 %v5843_v34  ;;  %v5932_v33 = vld [vmem:[#allocation5 + $0x4f4] ss:$48 sps:$4 sm:$0xff]   ;;  %v5935_v34 = vld [vmem:[#allocation5 + $0x4fc] ss:$48 sps:$4 sm:$0xff]  }
  0xb7   :  { %750 = vmatprep.subr.bf16.mxu0 %v5848_v35  ;;  %836 = vmatprep.subr.bf16.mxu1 %v5851_v36  ;;  %v5930_v35 = vld [vmem:[#allocation5 + $0x4f0] ss:$48 sps:$4 sm:$0xff]   ;;  %v5933_v36 = vld [vmem:[#allocation5 + $0x4f8] ss:$48 sps:$4 sm:$0xff]  }
  0xba   :  { %751 = vmatpush1.bf16.msra.mxu0 %v5846_v37  ;;  %837 = vmatpush1.bf16.msra.mxu1 %v5849_v38  ;;  %v5938_v37 = vld [vmem:[#allocation5 + $0x554] ss:$48 sps:$4 sm:$0xff]   ;;  %v5941_v38 = vld [vmem:[#allocation5 + $0x55c] ss:$48 sps:$4 sm:$0xff]  }
  0xbb   :  { %1603 = vmatprep.subr.bf16.mxu0 %v5854_v41  ;;  %1689 = vmatprep.subr.bf16.mxu1 %v5857_v42  ;;  %v5944_v41 = vld [vmem:[#allocation5 + $0x5b4] ss:$48 sps:$4 sm:$0xff]   ;;  %v5947_v42 = vld [vmem:[#allocation5 + $0x5bc] ss:$48 sps:$4 sm:$0xff]  }
  0xbd   :  { %769 = vmatmul.mubr.bf16.vlgmr.msra.gmra.mrb[0].mxu0 %v6780_v43  ;;  %855 = vmatmul.mubr.bf16.vlgmr.msra.gmra.mrb[0].mxu1 %v6780_v43 }
  0xbe   :  { %1604 = vmatpush1.bf16.msra.mxu0 %v5852_v44  ;;  %1690 = vmatpush1.bf16.msra.mxu1 %v5855_v45  ;;  %v5942_v44 = vld [vmem:[#allocation5 + $0x5b0] ss:$48 sps:$4 sm:$0xff]   ;;  %v5945_v45 = vld [vmem:[#allocation5 + $0x5b8] ss:$48 sps:$4 sm:$0xff]  }
  0xbf   :  { %1605 = vmatprep.subr.bf16.mxu0 %v5860_v46  ;;  %1691 = vmatprep.subr.bf16.mxu1 %v5863_v47  ;;  %v5950_v46 = vld [vmem:[#allocation5 + $0x614] ss:$48 sps:$4 sm:$0xff]   ;;  %v5953_v47 = vld [vmem:[#allocation5 + $0x61c] ss:$48 sps:$4 sm:$0xff]  }
  0xc0   :  { %1635 = vmatprep.mubr.bf16.mxu0 %v6770_v50  ;;  %1721 = vmatprep.mubr.bf16.mxu1 %v6770_v50 }
  0xc2   :  { %1606 = vmatpush1.bf16.msra.mxu0 %v5858_v48  ;;  %1692 = vmatpush1.bf16.msra.mxu1 %v5861_v49  ;;  %v5948_v48 = vld [vmem:[#allocation5 + $0x610] ss:$48 sps:$4 sm:$0xff]   ;;  %v5951_v49 = vld [vmem:[#allocation5 + $0x618] ss:$48 sps:$4 sm:$0xff]  }
  0xc3   :  { %1607 = vmatprep.subr.bf16.mxu0 %v5866_v51  ;;  %1693 = vmatprep.subr.bf16.mxu1 %v5869_v52  ;;  %v5956_v51 = vld [vmem:[#allocation5 + $0x674] ss:$48 sps:$4 sm:$0xff]   ;;  %v5959_v52 = vld [vmem:[#allocation5 + $0x67c] ss:$48 sps:$4 sm:$0xff]  }
  0xc6   :  { %1608 = vmatpush1.bf16.msra.mxu0 %v5864_v53  ;;  %1694 = vmatpush1.bf16.msra.mxu1 %v5867_v54  ;;  %v5954_v53 = vld [vmem:[#allocation5 + $0x670] ss:$48 sps:$4 sm:$0xff]   ;;  %v5957_v54 = vld [vmem:[#allocation5 + $0x678] ss:$48 sps:$4 sm:$0xff]  }
  0xc7   :  { %1609 = vmatprep.subr.bf16.mxu0 %v5872_v55  ;;  %1695 = vmatprep.subr.bf16.mxu1 %v5875_v56  ;;  %v5962_v55 = vld [vmem:[#allocation5 + $0x6d4] ss:$48 sps:$4 sm:$0xff]   ;;  %v5965_v56 = vld [vmem:[#allocation5 + $0x6dc] ss:$48 sps:$4 sm:$0xff]  }
  0xca   :  { %1610 = vmatpush1.bf16.msra.mxu0 %v5870_v57  ;;  %1696 = vmatpush1.bf16.msra.mxu1 %v5873_v58  ;;  %v5960_v57 = vld [vmem:[#allocation5 + $0x6d0] ss:$48 sps:$4 sm:$0xff]   ;;  %v5963_v58 = vld [vmem:[#allocation5 + $0x6d8] ss:$48 sps:$4 sm:$0xff]  }
  0xcb   :  { %1611 = vmatprep.subr.bf16.mxu0 %v5878_v59  ;;  %1697 = vmatprep.subr.bf16.mxu1 %v5881_v60  ;;  %v5968_v59 = vld [vmem:[#allocation5 + $0x734] ss:$48 sps:$4 sm:$0xff]   ;;  %v5971_v60 = vld [vmem:[#allocation5 + $0x73c] ss:$48 sps:$4 sm:$0xff]  }
  0xce   :  { %1612 = vmatpush1.bf16.msra.mxu0 %v5876_v61  ;;  %1698 = vmatpush1.bf16.msra.mxu1 %v5879_v62  ;;  %v5966_v61 = vld [vmem:[#allocation5 + $0x730] ss:$48 sps:$4 sm:$0xff]   ;;  %v5969_v62 = vld [vmem:[#allocation5 + $0x738] ss:$48 sps:$4 sm:$0xff]  }
  0xcf   :  { %1613 = vmatprep.subr.bf16.mxu0 %v5884_v63  ;;  %1699 = vmatprep.subr.bf16.mxu1 %v5887_v0  ;;  %v5974_v63 = vld [vmem:[#allocation5 + $0x794] ss:$48 sps:$4 sm:$0xff]   ;;  %v5977_v0 = vld [vmem:[#allocation5 + $0x79c] ss:$48 sps:$4 sm:$0xff]  }
  0xd2   :  { %1614 = vmatpush1.bf16.msra.mxu0 %v5882_v1  ;;  %1700 = vmatpush1.bf16.msra.mxu1 %v5885_v2  ;;  %v5972_v1 = vld [vmem:[#allocation5 + $0x790] ss:$48 sps:$4 sm:$0xff]   ;;  %v5975_v2 = vld [vmem:[#allocation5 + $0x798] ss:$48 sps:$4 sm:$0xff]  }
  0xd3   :  { %1615 = vmatprep.subr.bf16.mxu0 %v5890_v3  ;;  %1701 = vmatprep.subr.bf16.mxu1 %v5893_v4  ;;  %v5980_v3 = vld [vmem:[#allocation5 + $0x7f4] ss:$48 sps:$4 sm:$0xff]   ;;  %v5983_v4 = vld [vmem:[#allocation5 + $0x7fc] ss:$48 sps:$4 sm:$0xff]  }
  0xd6   :  { %1616 = vmatpush1.bf16.msra.mxu0 %v5888_v5  ;;  %1702 = vmatpush1.bf16.msra.mxu1 %v5891_v6  ;;  %v5978_v5 = vld [vmem:[#allocation5 + $0x7f0] ss:$48 sps:$4 sm:$0xff]   ;;  %v5981_v6 = vld [vmem:[#allocation5 + $0x7f8] ss:$48 sps:$4 sm:$0xff]  }
  0xd7   :  { %1617 = vmatprep.subr.bf16.mxu0 %v5896_v7  ;;  %1703 = vmatprep.subr.bf16.mxu1 %v5899_v9  ;;  %v5986_v7 = vld [vmem:[#allocation5 + $0x854] ss:$48 sps:$4 sm:$0xff]   ;;  %v5989_v9 = vld [vmem:[#allocation5 + $0x85c] ss:$48 sps:$4 sm:$0xff]  }
  0xda   :  { %1618 = vmatpush1.bf16.msra.mxu0 %v5894_v10  ;;  %1704 = vmatpush1.bf16.msra.mxu1 %v5897_v11  ;;  %v5984_v10 = vld [vmem:[#allocation5 + $0x850] ss:$48 sps:$4 sm:$0xff]   ;;  %v5987_v11 = vld [vmem:[#allocation5 + $0x858] ss:$48 sps:$4 sm:$0xff]  }
  0xdb   :  { %1619 = vmatprep.subr.bf16.mxu0 %v5902_v12  ;;  %1705 = vmatprep.subr.bf16.mxu1 %v5905_v13  ;;  %v5992_v12 = vld [vmem:[#allocation5 + $0x8b4] ss:$48 sps:$4 sm:$0xff]   ;;  %v5995_v13 = vld [vmem:[#allocation5 + $0x8bc] ss:$48 sps:$4 sm:$0xff]  }
  0xde   :  { %1620 = vmatpush1.bf16.msra.mxu0 %v5900_v14  ;;  %1706 = vmatpush1.bf16.msra.mxu1 %v5903_v15  ;;  %v5990_v14 = vld [vmem:[#allocation5 + $0x8b0] ss:$48 sps:$4 sm:$0xff]   ;;  %v5993_v15 = vld [vmem:[#allocation5 + $0x8b8] ss:$48 sps:$4 sm:$0xff]  }
  0xdf   :  { %1621 = vmatprep.subr.bf16.mxu0 %v5908_v17  ;;  %1707 = vmatprep.subr.bf16.mxu1 %v5911_v18  ;;  %v5998_v17 = vld [vmem:[#allocation8 + $0x304] ss:$12 sps:$4 sm:$0xff]   ;;  %v5996_v18 = vld [vmem:[#allocation8 + $0x300] ss:$12 sps:$4 sm:$0xff]  }
  0xe2   :  { %1622 = vmatpush1.bf16.msra.mxu0 %v5906_v19  ;;  %1708 = vmatpush1.bf16.msra.mxu1 %v5909_v20  ;;  %v6001_v19 = vld [vmem:[#allocation8 + $0x31c] ss:$12 sps:$4 sm:$0xff]   ;;  %v5999_v20 = vld [vmem:[#allocation8 + $0x318] ss:$12 sps:$4 sm:$0xff]  }
  0xe3   :  { %1623 = vmatprep.subr.bf16.mxu0 %v5914_v21  ;;  %1709 = vmatprep.subr.bf16.mxu1 %v5917_v22  ;;  %v6023_v21 = vld [vmem:[#allocation8 + $0x3c8] ss:$12 sps:$4 sm:$0xff]  }
  0xe4   :  { %v6024_v22 = vld [vmem:[#allocation8 + $0x308] ss:$12 sps:$4 sm:$0xff]  }
  0xe6   :  { %1624 = vmatpush1.bf16.msra.mxu0 %v5912_v23  ;;  %1710 = vmatpush1.bf16.msra.mxu1 %v5915_v24  ;;  %v6004_v23 = vld [vmem:[#allocation8 + $0x334] ss:$12 sps:$4 sm:$0xff]  }
  0xe7   :  { %1625 = vmatprep.subr.bf16.mxu0 %v5920_v25  ;;  %1711 = vmatprep.subr.bf16.mxu1 %v5923_v26  ;;  %v6028_v24 = vld [vmem:[#allocation8 + $0x3e0] ss:$12 sps:$4 sm:$0xff]   ;;  %v6002_v26 = vld [vmem:[#allocation8 + $0x330] ss:$12 sps:$4 sm:$0xff]  }
  0xe8   :  { %v6029_v25 = vld [vmem:[#allocation8 + $0x320] ss:$12 sps:$4 sm:$0xff]  }
  0xea   :  { %1626 = vmatpush1.bf16.msra.mxu0 %v5918_v27  ;;  %1712 = vmatpush1.bf16.msra.mxu1 %v5921_v28  ;;  %v6033_v27 = vld [vmem:[#allocation8 + $0x3f8] ss:$12 sps:$4 sm:$0xff]  }
  0xeb   :  { %1627 = vmatprep.subr.bf16.mxu0 %v5926_v29  ;;  %1713 = vmatprep.subr.bf16.mxu1 %v5929_v30  ;;  %v6007_v28 = vld [vmem:[#allocation8 + $0x34c] ss:$12 sps:$4 sm:$0xff]   ;;  %v6005_v29 = vld [vmem:[#allocation8 + $0x348] ss:$12 sps:$4 sm:$0xff]   ;;  %v6010_v30 = vld [vmem:[#allocation8 + $0x364] ss:$12 sps:$4 sm:$0xff]  }
  0xee   :  { %1628 = vmatpush1.bf16.msra.mxu0 %v5924_v31  ;;  %1714 = vmatpush1.bf16.msra.mxu1 %v5927_v32  ;;  %v6034_v31 = vld [vmem:[#allocation8 + $0x338] ss:$12 sps:$4 sm:$0xff]   ;;  %v6038_v32 = vld [vmem:[#allocation8 + $0x410] ss:$12 sps:$4 sm:$0xff]  }
  0xef   :  { %1629 = vmatprep.subr.bf16.mxu0 %v5932_v33  ;;  %1715 = vmatprep.subr.bf16.mxu1 %v5935_v34  ;;  %v6039_v33 = vld [vmem:[#allocation8 + $0x350] ss:$12 sps:$4 sm:$0xff]   ;;  %v6008_v34 = vld [vmem:[#allocation8 + $0x360] ss:$12 sps:$4 sm:$0xff]  }
  0xf2   :  { %1630 = vmatpush1.bf16.msra.mxu0 %v5930_v35  ;;  %1716 = vmatpush1.bf16.msra.mxu1 %v5933_v36  ;;  %v6043_v35 = vld [vmem:[#allocation8 + $0x428] ss:$12 sps:$4 sm:$0xff]  }
  0xf3   :  { %1631 = vmatprep.subr.bf16.mxu0 %v5938_v37  ;;  %1717 = vmatprep.subr.bf16.mxu1 %v5941_v38  ;;  %v6013_v36 = vld [vmem:[#allocation8 + $0x37c] ss:$12 sps:$4 sm:$0xff]   ;;  %v6011_v38 = vld [vmem:[#allocation8 + $0x378] ss:$12 sps:$4 sm:$0xff]  }
  0xf4   :  { %v6044_v37 = vld [vmem:[#allocation8 + $0x368] ss:$12 sps:$4 sm:$0xff]  }
  0xf6   :  { %1632 = vmatpush1.bf16.msra.mxu0 %v5936_v39  ;;  %1718 = vmatpush1.bf16.msra.mxu1 %v5939_v40  ;;  %v6048_v39 = vld [vmem:[#allocation8 + $0x440] ss:$12 sps:$4 sm:$0xff]  }
  0xf7   :  { %1633 = vmatprep.subr.bf16.mxu0 %v5944_v41  ;;  %1719 = vmatprep.subr.bf16.mxu1 %v5947_v42  ;;  %v6016_v40 = vld [vmem:[#allocation8 + $0x394] ss:$12 sps:$4 sm:$0xff]   ;;  %v6014_v42 = vld [vmem:[#allocation8 + $0x390] ss:$12 sps:$4 sm:$0xff]  }
  0xf8   :  { %v6049_v41 = vld [vmem:[#allocation8 + $0x380] ss:$12 sps:$4 sm:$0xff]  }
  0xfa   :  { %1634 = vmatpush1.bf16.msra.mxu0 %v5942_v44  ;;  %1720 = vmatpush1.bf16.msra.mxu1 %v5945_v45  ;;  %v6019_v44 = vld [vmem:[#allocation8 + $0x3ac] ss:$12 sps:$4 sm:$0xff]   ;;  %v6017_v45 = vld [vmem:[#allocation8 + $0x3a8] ss:$12 sps:$4 sm:$0xff]  }
  0xfb   :  { %1646 = vmatprep.subr.bf16.mxu0 %v5950_v46  ;;  %1732 = vmatprep.subr.bf16.mxu1 %v5953_v47  ;;  %v6022_v46 = vld [vmem:[#allocation8 + $0x3c4] ss:$12 sps:$4 sm:$0xff]   ;;  %v6020_v47 = vld [vmem:[#allocation8 + $0x3c0] ss:$12 sps:$4 sm:$0xff]  }
  0xfd   :  { %1636 = vmatmul.mubr.bf16.vlgmr.msra.gmra.mrb[4].mxu0 %v6774_v8  ;;  %1722 = vmatmul.mubr.bf16.vlgmr.msra.gmra.mrb[4].mxu1 %v6774_v8 }
  0xfe   :  { %1647 = vmatpush1.bf16.msra.mxu0 %v5948_v48  ;;  %1733 = vmatpush1.bf16.msra.mxu1 %v5951_v49  ;;  %v6027_v48 = vld [vmem:[#allocation8 + $0x3dc] ss:$12 sps:$4 sm:$0xff]   ;;  %v6025_v49 = vld [vmem:[#allocation8 + $0x3d8] ss:$12 sps:$4 sm:$0xff]  }
  0xff   :  { %1648 = vmatprep.subr.bf16.mxu0 %v5956_v51  ;;  %1734 = vmatprep.subr.bf16.mxu1 %v5959_v52  ;;  %v6032_v51 = vld [vmem:[#allocation8 + $0x3f4] ss:$12 sps:$4 sm:$0xff]   ;;  %v6030_v52 = vld [vmem:[#allocation8 + $0x3f0] ss:$12 sps:$4 sm:$0xff]  }
 0x100   :  { %1678 = vmatprep.mubr.bf16.mxu0 %v6675_v16  ;;  %1764 = vmatprep.mubr.bf16.mxu1 %v6675_v16 }
 0x102   :  { %1649 = vmatpush1.bf16.msra.mxu0 %v5954_v53  ;;  %1735 = vmatpush1.bf16.msra.mxu1 %v5957_v54  ;;  %v6037_v53 = vld [vmem:[#allocation8 + $0x40c] ss:$12 sps:$4 sm:$0xff]   ;;  %v6035_v54 = vld [vmem:[#allocation8 + $0x408] ss:$12 sps:$4 sm:$0xff]  }
 0x103   :  { %1650 = vmatprep.subr.bf16.mxu0 %v5962_v55  ;;  %1736 = vmatprep.subr.bf16.mxu1 %v5965_v56  ;;  %v6042_v55 = vld [vmem:[#allocation8 + $0x424] ss:$12 sps:$4 sm:$0xff]   ;;  %v6040_v56 = vld [vmem:[#allocation8 + $0x420] ss:$12 sps:$4 sm:$0xff]  }
 0x106   :  { %1651 = vmatpush1.bf16.msra.mxu0 %v5960_v57  ;;  %1737 = vmatpush1.bf16.msra.mxu1 %v5963_v58  ;;  %v6047_v57 = vld [vmem:[#allocation8 + $0x43c] ss:$12 sps:$4 sm:$0xff]   ;;  %v6045_v58 = vld [vmem:[#allocation8 + $0x438] ss:$12 sps:$4 sm:$0xff]  }
 0x107   :  { %1652 = vmatprep.subr.bf16.mxu0 %v5968_v59  ;;  %1738 = vmatprep.subr.bf16.mxu1 %v5971_v60  ;;  %v6052_v59 = vld [vmem:[#allocation8 + $0x454] ss:$12 sps:$4 sm:$0xff]   ;;  %v6053_v60 = vld [vmem:[#allocation8 + $0x458] ss:$12 sps:$4 sm:$0xff]  }
 0x10a   :  { %1653 = vmatpush1.bf16.msra.mxu0 %v5966_v61  ;;  %1739 = vmatpush1.bf16.msra.mxu1 %v5969_v62  ;;  %v6050_v61 = vld [vmem:[#allocation8 + $0x450] ss:$12 sps:$4 sm:$0xff]   ;;  %v6054_v62 = vld [vmem:[#allocation8 + $0x398] ss:$12 sps:$4 sm:$0xff]  }
 0x10b   :  { %1654 = vmatprep.subr.bf16.mxu0 %v5974_v63  ;;  %1740 = vmatprep.subr.bf16.mxu1 %v5977_v0  ;;  %v6057_v63 = vld [vmem:[#allocation8 + $0x46c] ss:$12 sps:$4 sm:$0xff]   ;;  %v6058_v0 = vld [vmem:[#allocation8 + $0x470] ss:$12 sps:$4 sm:$0xff]  }
 0x10e   :  { %1655 = vmatpush1.bf16.msra.mxu0 %v5972_v1  ;;  %1741 = vmatpush1.bf16.msra.mxu1 %v5975_v2  ;;  %v6055_v1 = vld [vmem:[#allocation8 + $0x468] ss:$12 sps:$4 sm:$0xff]   ;;  %v6059_v2 = vld [vmem:[#allocation8 + $0x3b0] ss:$12 sps:$4 sm:$0xff]  }
 0x10f   :  { %1656 = vmatprep.subr.bf16.mxu0 %v5980_v3  ;;  %1742 = vmatprep.subr.bf16.mxu1 %v5983_v4  ;;  %v6062_v3 = vld [vmem:[#allocation8 + $0x484] ss:$12 sps:$4 sm:$0xff]   ;;  %v6063_v4 = vld [vmem:[#allocation8 + $0x548] ss:$12 sps:$4 sm:$0xff]  }
 0x112   :  { %1657 = vmatpush1.bf16.msra.mxu0 %v5978_v5  ;;  %1743 = vmatpush1.bf16.msra.mxu1 %v5981_v6  ;;  %v193_v5 = vlaneseq }
 0x113   :  { %1658 = vmatprep.subr.bf16.mxu0 %v5986_v7  ;;  %1744 = vmatprep.subr.bf16.mxu1 %v5989_v9  ;;  %v191_v7 = vld [vmem:[#allocation7] sm:$0xf] }
 0x114   :  { %v194_v6 = vshrl.u32 %v193_v5, 7 }
 0x116   :  { %1659 = vmatpush1.bf16.msra.mxu0 %v5984_v10  ;;  %1745 = vmatpush1.bf16.msra.mxu1 %v5987_v11  ;;  %v6792_v9 = vsub.s32 0, %v194_v6  ;;  %v6794_v10 = vsub.s32 2, %v194_v6  ;;  %v6796_v11 = vsub.s32 1, %v194_v6 }
 0x117   :  { %1660 = vmatprep.subr.bf16.mxu0 %v5992_v12  ;;  %1746 = vmatprep.subr.bf16.mxu1 %v5995_v13  ;;  %v6798_v12 = vsub.s32 3, %v194_v6 }
 0x118   :  { %v196_v13 = vrot.slane %v191_v7, %v6792_v9 }
 0x11a   :  { %1661 = vmatpush1.bf16.msra.mxu0 %v5990_v14  ;;  %1747 = vmatpush1.bf16.msra.mxu1 %v5993_v15  ;;  %v204_v14 = vrot.slane %v191_v7, %v6794_v10  ;;  %v200_v15 = vrot.slane %v191_v7, %v6796_v11 }
 0x11b   :  { %2427 = vmatprep.subr.bf16.mxu0 %v5998_v17  ;;  %5495 = vmatprep.subr.bf16.mxu1 %v6023_v21  ;;  %v208_v17 = vrot.slane %v191_v7, %v6798_v12 }
 0x11d   :  { %1679 = vmatmul.mubr.bf16.vlgmr.msra.gmra.mrb[4].mxu0 %v6780_v43  ;;  %1765 = vmatmul.mubr.bf16.vlgmr.msra.gmra.mrb[4].mxu1 %v6780_v43 }
 0x11e   :  { %2428 = vmatpush1.bf16.msra.mxu0 %v5996_v18  ;;  %5496 = vmatpush3.bf16.msra.mxu1 %v6024_v22 }
 0x11f   :  { %2429 = vmatprep.subr.bf16.mxu0 %v6001_v19  ;;  %5497 = vmatprep.subr.bf16.mxu1 %v6028_v24 }
 0x122   :  { %2430 = vmatpush1.bf16.msra.mxu0 %v5999_v20  ;;  %5498 = vmatpush3.bf16.msra.mxu1 %v6029_v25 }
 0x123   :  { %2431 = vmatprep.subr.bf16.mxu0 %v6004_v23  ;;  %5499 = vmatprep.subr.bf16.mxu1 %v6033_v27 }
 0x126   :  { %2432 = vmatpush1.bf16.msra.mxu0 %v6002_v26  ;;  %5500 = vmatpush3.bf16.msra.mxu1 %v6034_v31 }
 0x127   :  { %2433 = vmatprep.subr.bf16.mxu0 %v6007_v28  ;;  %5501 = vmatprep.subr.bf16.mxu1 %v6038_v32 }
 0x12a   :  { %2434 = vmatpush1.bf16.msra.mxu0 %v6005_v29  ;;  %5502 = vmatpush3.bf16.msra.mxu1 %v6039_v33 }
 0x12b   :  { %2435 = vmatprep.subr.bf16.mxu0 %v6010_v30  ;;  %5503 = vmatprep.subr.bf16.mxu1 %v6043_v35 }
 0x12e   :  { %2436 = vmatpush1.bf16.msra.mxu0 %v6008_v34  ;;  %5504 = vmatpush3.bf16.msra.mxu1 %v6044_v37 }
 0x12f   :  { %2437 = vmatprep.subr.bf16.mxu0 %v6013_v36  ;;  %5505 = vmatprep.subr.bf16.mxu1 %v6048_v39 }
 0x132   :  { %2438 = vmatpush1.bf16.msra.mxu0 %v6011_v38  ;;  %5506 = vmatpush3.bf16.msra.mxu1 %v6049_v41 }
 0x133   :  { %2439 = vmatprep.subr.bf16.mxu0 %v6016_v40  ;;  %5507 = vmatprep.subr.bf16.mxu1 %v6053_v60 }
 0x136   :  { %2440 = vmatpush1.bf16.msra.mxu0 %v6014_v42  ;;  %5508 = vmatpush3.bf16.msra.mxu1 %v6054_v62 }
 0x137   :  { %2441 = vmatprep.subr.bf16.mxu0 %v6019_v44  ;;  %5509 = vmatprep.subr.bf16.mxu1 %v6058_v0 }
 0x13a   :  { %2442 = vmatpush1.bf16.msra.mxu0 %v6017_v45  ;;  %5510 = vmatpush3.bf16.msra.mxu1 %v6059_v2 }
 0x13b   :  { %2443 = vmatprep.subr.bf16.mxu0 %v6022_v46  ;;  %5517 = vmatprep.subr.bf16.mxu1 %v6063_v4 }
 0x13e   :  { %2444 = vmatpush1.bf16.msra.mxu0 %v6020_v47  ;;  %v1101_v47 = vld [vmem:[#allocation7 + $0x4] sm:$0xf] }
 0x13f   :  { %2445 = vmatprep.subr.bf16.mxu0 %v6027_v48  ;;  %v1106_v48 = vrot.slane %v1101_v47, %v6792_v9 }
 0x142   :  { %2446 = vmatpush1.bf16.msra.mxu0 %v6025_v49  ;;  %v1114_v49 = vrot.slane %v1101_v47, %v6794_v10 }
 0x143   :  { %2447 = vmatprep.subr.bf16.mxu0 %v6032_v51  ;;  %v1110_v51 = vrot.slane %v1101_v47, %v6796_v11 }
 0x146   :  { %2448 = vmatpush1.bf16.msra.mxu0 %v6030_v52  ;;  %v1118_v52 = vrot.slane %v1101_v47, %v6798_v12  ;;  %v6088_v47 = vld [vmem:[#allocation8 + $0x5c0] ss:$12 sps:$4 sm:$0xff]  }
 0x147   :  { %2449 = vmatprep.subr.bf16.mxu0 %v6037_v53 }
 0x14a   :  { %2450 = vmatpush1.bf16.msra.mxu0 %v6035_v54 }
 0x14b   :  { %2451 = vmatprep.subr.bf16.mxu0 %v6042_v55 }
 0x14e   :  { %2452 = vmatpush1.bf16.msra.mxu0 %v6040_v56 }
 0x14f   :  { %2453 = vmatprep.subr.bf16.mxu0 %v6047_v57 }
 0x152   :  { %2454 = vmatpush1.bf16.msra.mxu0 %v6045_v58 }
 0x153   :  { %2455 = vmatprep.subr.bf16.mxu0 %v6052_v59 }
 0x156   :  { %2456 = vmatpush1.bf16.msra.mxu0 %v6050_v61 }
 0x157   :  { %2457 = vmatprep.subr.bf16.mxu0 %v6057_v63 }
 0x15a   :  { %2458 = vmatpush1.bf16.msra.mxu0 %v6055_v1 }
 0x15b   :  { %2470 = vmatprep.subr.bf16.mxu0 %v6062_v3 }
 0x190   :  { %v770_v18 = vpop.f32.mrb[0].mxu0  ;;  %v856_v19 = vpop.f32.mrb[0].mxu1 }
 0x191   :  { %v5627_v20 = vadd.f32 %v770_v18, %v196_v13  ;;  %v5631_v21 = vadd.f32 %v856_v19, %v204_v14  ;;  %v772_v22 = vpop.f32.mrb[1].mxu0  ;;  %v858_v23 = vpop.f32.mrb[1].mxu1 }
 0x192   :  { %v5628_v24 = vadd.f32 %v772_v22, %v200_v15  ;;  %v5632_v25 = vadd.f32 %v858_v23, %v208_v17  ;;  %v774_v26 = vpop.f32.mrb[2].mxu0  ;;  %v860_v27 = vpop.f32.mrb[2].mxu1  ;;  %v6060_v23 = vld [vmem:[#allocation8 + $0x480] ss:$12 sps:$4 sm:$0xff]  }
 0x193   :  { %v867_v28 = vmax.f32 %v5631_v21, 0.0  ;;  %v5629_v29 = vadd.f32 %v774_v26, %v196_v13  ;;  %v5633_v30 = vadd.f32 %v860_v27, %v204_v14  ;;  %v776_v31 = vpop.f32.mrb[3].mxu0  ;;  %v862_v32 = vpop.f32.mrb[3].mxu1  ;;  %v865_v35 = vmax.f32 %v5627_v20, 0.0  ;;  %v6068_v26 = vld [vmem:[#allocation8 + $0x560] ss:$12 sps:$4 sm:$0xff]  }
 0x194   :  { %v5630_v33 = vadd.f32 %v776_v31, %v200_v15  ;;  %v5634_v34 = vadd.f32 %v862_v32, %v208_v17  ;;  %v866_v38 = vmax.f32 %v5628_v24, 0.0  ;;  %v868_v39 = vmax.f32 %v5632_v25, 0.0  ;;  %v6064_v24 = vld [vmem:[#allocation8 + $0x488] ss:$12 sps:$4 sm:$0xff]   ;;  %v6065_v27 = vld [vmem:[#allocation8 + $0x498] ss:$12 sps:$4 sm:$0xff]  }
 0x195   :  { %v869_v36 = vmax.f32 %v5629_v29, 0.0  ;;  %v871_v37 = vmax.f32 %v5633_v30, 0.0  ;;  %v6067_v25 = vld [vmem:[#allocation8 + $0x49c] ss:$12 sps:$4 sm:$0xff]   ;;  %v6072_v29 = vld [vmem:[#allocation8 + $0x4b4] ss:$12 sps:$4 sm:$0xff]  }
 0x196   :  { %v870_v40 = vmax.f32 %v5630_v33, 0.0  ;;  %v872_v41 = vmax.f32 %v5634_v34, 0.0  ;;  %v6073_v30 = vld [vmem:[#allocation8 + $0x578] ss:$12 sps:$4 sm:$0xff]   ;;  %v6070_v31 = vld [vmem:[#allocation8 + $0x4b0] ss:$12 sps:$4 sm:$0xff]  }
 0x197   :  { %v6804_v42 = vpack.c.bf16 %v869_v36, %v865_v35  ;;  %v6806_v44 = vpack.c.bf16 %v871_v37, %v867_v28  ;;  %v6069_v28 = vld [vmem:[#allocation8 + $0x4a0] ss:$12 sps:$4 sm:$0xff]   ;;  %v6074_v32 = vld [vmem:[#allocation8 + $0x4b8] ss:$12 sps:$4 sm:$0xff]   ;;  %v6078_v34 = vld [vmem:[#allocation8 + $0x590] ss:$12 sps:$4 sm:$0xff]  }
 0x198   :  { %v6808_v45 = vpack.c.bf16 %v870_v40, %v866_v38  ;;  %v6810_v46 = vpack.c.bf16 %v872_v41, %v868_v39  ;;  %v6077_v33 = vld [vmem:[#allocation8 + $0x4cc] ss:$12 sps:$4 sm:$0xff]   ;;  %v6075_v35 = vld [vmem:[#allocation8 + $0x4c8] ss:$12 sps:$4 sm:$0xff]   ;;  %v6079_v36 = vld [vmem:[#allocation8 + $0x4d0] ss:$12 sps:$4 sm:$0xff]  }
 0x199   :  { %v6082_v37 = vld [vmem:[#allocation8 + $0x4e4] ss:$12 sps:$4 sm:$0xff]   ;;  %v6083_v38 = vld [vmem:[#allocation8 + $0x5a8] ss:$12 sps:$4 sm:$0xff]   ;;  %v6080_v39 = vld [vmem:[#allocation8 + $0x4e0] ss:$12 sps:$4 sm:$0xff]  }
 0x19a   :  { %v6084_v40 = vld [vmem:[#allocation8 + $0x4e8] ss:$12 sps:$4 sm:$0xff]  }
 0x19b   :  { %v6087_v41 = vld [vmem:[#allocation8 + $0x4fc] ss:$12 sps:$4 sm:$0xff]  }
 0x1f0   :  { %v1680_v53 = vpop.f32.mrb[4].mxu0  ;;  %v1766_v54 = vpop.f32.mrb[4].mxu1 }
 0x1f1   :  { %v5635_v55 = vadd.f32 %v1680_v53, %v1106_v48  ;;  %v5639_v56 = vadd.f32 %v1766_v54, %v1114_v49  ;;  %v1682_v57 = vpop.f32.mrb[5].mxu0  ;;  %v1768_v58 = vpop.f32.mrb[5].mxu1  ;;  %v6090_v53 = vld [vmem:[#allocation8 + $0x510] ss:$12 sps:$4 sm:$0xff]   ;;  %v6094_v54 = vld [vmem:[#allocation8 + $0x518] ss:$12 sps:$4 sm:$0xff]  }
 0x1f2   :  { %v5636_v59 = vadd.f32 %v1682_v57, %v1110_v51  ;;  %v5640_v60 = vadd.f32 %v1768_v58, %v1118_v52  ;;  %v1684_v61 = vpop.f32.mrb[6].mxu0  ;;  %v1770_v62 = vpop.f32.mrb[6].mxu1  ;;  %v6095_v57 = vld [vmem:[#allocation8 + $0x528] ss:$12 sps:$4 sm:$0xff]   ;;  %v6099_v58 = vld [vmem:[#allocation8 + $0x530] ss:$12 sps:$4 sm:$0xff]  }
 0x1f3   :  { %v1777_v63 = vmax.f32 %v5639_v56, 0.0  ;;  %v5637_v0 = vadd.f32 %v1684_v61, %v1106_v48  ;;  %v5641_v1 = vadd.f32 %v1770_v62, %v1114_v49  ;;  %v1686_v2 = vpop.f32.mrb[7].mxu0  ;;  %v1772_v3 = vpop.f32.mrb[7].mxu1  ;;  %v1775_v6 = vmax.f32 %v5635_v55, 0.0  ;;  %v6085_v48 = vld [vmem:[#allocation8 + $0x4f8] ss:$12 sps:$4 sm:$0xff]  }
 0x1f4   :  { %v5638_v4 = vadd.f32 %v1686_v2, %v1110_v51  ;;  %v5642_v5 = vadd.f32 %v1772_v3, %v1118_v52  ;;  %v1776_v14 = vmax.f32 %v5636_v59, 0.0  ;;  %v1778_v15 = vmax.f32 %v5640_v60, 0.0  ;;  %v6089_v49 = vld [vmem:[#allocation8 + $0x500] ss:$12 sps:$4 sm:$0xff]   ;;  %v6093_v52 = vld [vmem:[#allocation8 + $0x5d8] ss:$12 sps:$4 sm:$0xff]  }
 0x1f5   :  { %v1779_v7 = vmax.f32 %v5637_v0, 0.0  ;;  %v1781_v13 = vmax.f32 %v5641_v1, 0.0  ;;  %v6092_v51 = vld [vmem:[#allocation8 + $0x514] ss:$12 sps:$4 sm:$0xff]   ;;  %v6097_v55 = vld [vmem:[#allocation8 + $0x52c] ss:$12 sps:$4 sm:$0xff]  }
 0x1f6   :  { %v1780_v17 = vmax.f32 %v5638_v4, 0.0  ;;  %v1782_v18 = vmax.f32 %v5642_v5, 0.0  ;;  %v6098_v56 = vld [vmem:[#allocation8 + $0x5f0] ss:$12 sps:$4 sm:$0xff]   ;;  %v6103_v60 = vld [vmem:[#allocation8 + $0xc8] ss:$12 sps:$4 sm:$0xff]  }
 0x1f7   :  { %v1783_v19 = vpack.c.bf16 %v1779_v7, %v1775_v6  ;;  %v6816_v20 = vpack.c.bf16 %v1781_v13, %v1777_v63  ;;  %v6102_v59 = vld [vmem:[#allocation8 + $0x544] ss:$12 sps:$4 sm:$0xff]   ;;  %v6100_v61 = vld [vmem:[#allocation8 + $0x540] ss:$12 sps:$4 sm:$0xff]   ;;  %v6104_v62 = vld [vmem:[#allocation8 + $0x8] ss:$12 sps:$4 sm:$0xff]  }
 0x1f8   :  { %v1784_v21 = vpack.c.bf16 %v1780_v17, %v1776_v14  ;;  %v1786_v22 = vpack.c.bf16 %v1782_v18, %v1778_v15  ;;  %v6107_v63 = vld [vmem:[#allocation8 + $0x55c] ss:$12 sps:$4 sm:$0xff]   ;;  %v6108_v0 = vld [vmem:[#allocation8 + $0xe0] ss:$12 sps:$4 sm:$0xff]   ;;  %v6105_v1 = vld [vmem:[#allocation8 + $0x558] ss:$12 sps:$4 sm:$0xff]  }
 0x1f9   :  { %v6109_v2 = vld [vmem:[#allocation8 + $0x20] ss:$12 sps:$4 sm:$0xff]   ;;  %v6113_v4 = vld [vmem:[#allocation8 + $0xf8] ss:$12 sps:$4 sm:$0xff]   ;;  %v6110_v5 = vld [vmem:[#allocation8 + $0x570] ss:$12 sps:$4 sm:$0xff]  }
 0x1fa   :  { %2459 = vmatprep.mubr.bf16.mxu0 %v1784_v21  ;;  %2545 = vmatprep.mubr.bf16.mxu1 %v1784_v21  ;;  %v6112_v3 = vld [vmem:[#allocation8 + $0x574] ss:$12 sps:$4 sm:$0xff]   ;;  %v6114_v6 = vld [vmem:[#allocation8 + $0x38] ss:$12 sps:$4 sm:$0xff]   ;;  %v6118_v13 = vld [vmem:[#allocation8 + $0x110] ss:$12 sps:$4 sm:$0xff]  }
 0x1fb   :  { %2460 = vmatmul.mubr.bf16.vlgmr.msra.gmra.mrb[8].mxu0 %v1783_v19  ;;  %2546 = vmatmul.mubr.bf16.vlgmr.msra.gmra.mrb[8].mxu1 %v1783_v19  ;;  %v6117_v7 = vld [vmem:[#allocation8 + $0x58c] ss:$12 sps:$4 sm:$0xff]   ;;  %v6115_v14 = vld [vmem:[#allocation8 + $0x588] ss:$12 sps:$4 sm:$0xff]   ;;  %v6119_v15 = vld [vmem:[#allocation8 + $0x50] ss:$12 sps:$4 sm:$0xff]  }
 0x1fc   :  { %2471 = vmatpush1.bf16.msra.mxu0 %v6060_v23  ;;  %5518 = vmatpush3.bf16.msra.mxu1 %v6064_v24  ;;  %v6122_v17 = vld [vmem:[#allocation8 + $0x5a4] ss:$12 sps:$4 sm:$0xff]   ;;  %v6123_v18 = vld [vmem:[#allocation8 + $0x128] ss:$12 sps:$4 sm:$0xff]   ;;  %v6120_v19 = vld [vmem:[#allocation8 + $0x5a0] ss:$12 sps:$4 sm:$0xff]  }
 0x1fd   :  { %2502 = vmatprep.mubr.bf16.mxu0 %v1786_v22  ;;  %2586 = vmatprep.mubr.bf16.mxu1 %v1786_v22  ;;  %v6124_v21 = vld [vmem:[#allocation8 + $0x68] ss:$12 sps:$4 sm:$0xff]   ;;  %v6128_v23 = vld [vmem:[#allocation8 + $0x140] ss:$12 sps:$4 sm:$0xff]   ;;  %v6125_v24 = vld [vmem:[#allocation8 + $0x5b8] ss:$12 sps:$4 sm:$0xff]  }
 0x1fe   :  { %2472 = vmatprep.subr.bf16.mxu0 %v6067_v25  ;;  %5519 = vmatprep.subr.bf16.mxu1 %v6068_v26  ;;  %v6127_v22 = vld [vmem:[#allocation8 + $0x5bc] ss:$12 sps:$4 sm:$0xff]   ;;  %v6129_v25 = vld [vmem:[#allocation8 + $0x80] ss:$12 sps:$4 sm:$0xff]  }
 0x1ff   :  { %v6132_v26 = vld [vmem:[#allocation8 + $0x5d4] ss:$12 sps:$4 sm:$0xff]  }
 0x200   :  { %2473 = vmatpush1.bf16.msra.mxu0 %v6065_v27  ;;  %5520 = vmatpush3.bf16.msra.mxu1 %v6069_v28  ;;  %v6133_v27 = vld [vmem:[#allocation8 + $0x158] ss:$12 sps:$4 sm:$0xff]   ;;  %v6130_v28 = vld [vmem:[#allocation8 + $0x5d0] ss:$12 sps:$4 sm:$0xff]  }
 0x201   :  { %2474 = vmatprep.subr.bf16.mxu0 %v6072_v29  ;;  %5521 = vmatprep.subr.bf16.mxu1 %v6073_v30  ;;  %v6134_v29 = vld [vmem:[#allocation8 + $0x98] ss:$12 sps:$4 sm:$0xff]  }
 0x202   :  { %v6137_v30 = vld [vmem:[#allocation8 + $0x5ec] ss:$12 sps:$4 sm:$0xff]  }
 0x204   :  { %2475 = vmatpush1.bf16.msra.mxu0 %v6070_v31  ;;  %5522 = vmatpush3.bf16.msra.mxu1 %v6074_v32  ;;  %v6138_v31 = vld [vmem:[#allocation8 + $0x170] ss:$12 sps:$4 sm:$0xff]   ;;  %v6135_v32 = vld [vmem:[#allocation8 + $0x5e8] ss:$12 sps:$4 sm:$0xff]  }
 0x205   :  { %2476 = vmatprep.subr.bf16.mxu0 %v6077_v33  ;;  %5523 = vmatprep.subr.bf16.mxu1 %v6078_v34  ;;  %v6139_v33 = vld [vmem:[#allocation8 + $0xb0] ss:$12 sps:$4 sm:$0xff]  }
 0x206   :  { %v6142_v34 = vld [vmem:[#allocation8 + $0x4] ss:$12 sps:$4 sm:$0xff]  }
 0x208   :  { %2477 = vmatpush1.bf16.msra.mxu0 %v6075_v35  ;;  %5524 = vmatpush3.bf16.msra.mxu1 %v6079_v36  ;;  %v6143_v35 = vld [vmem:[#allocation8 + $0x248] ss:$12 sps:$4 sm:$0xff]   ;;  %v6140_v36 = vld [vmem:[#allocation8] ss:$12 sps:$4 sm:$0xff]  }
 0x209   :  { %2478 = vmatprep.subr.bf16.mxu0 %v6082_v37  ;;  %5525 = vmatprep.subr.bf16.mxu1 %v6083_v38  ;;  %v6144_v37 = vld [vmem:[#allocation8 + $0x188] ss:$12 sps:$4 sm:$0xff]  }
 0x20a   :  { %v6147_v38 = vld [vmem:[#allocation8 + $0x1c] ss:$12 sps:$4 sm:$0xff]  }
 0x20c   :  { %2479 = vmatpush1.bf16.msra.mxu0 %v6080_v39  ;;  %5526 = vmatpush3.bf16.msra.mxu1 %v6084_v40  ;;  %v6148_v39 = vld [vmem:[#allocation8 + $0x260] ss:$12 sps:$4 sm:$0xff]   ;;  %v6145_v40 = vld [vmem:[#allocation8 + $0x18] ss:$12 sps:$4 sm:$0xff]  }
 0x20d   :  { %2480 = vmatprep.subr.bf16.mxu0 %v6087_v41  ;;  %5527 = vmatprep.subr.bf16.mxu1 %v6088_v47  ;;  %v6149_v41 = vld [vmem:[#allocation8 + $0x1a0] ss:$12 sps:$4 sm:$0xff]  }
 0x20e   :  { %v6152_v47 = vld [vmem:[#allocation8 + $0x34] ss:$12 sps:$4 sm:$0xff]  }
 0x210   :  { %2481 = vmatpush1.bf16.msra.mxu0 %v6085_v48  ;;  %5528 = vmatpush3.bf16.msra.mxu1 %v6089_v49  ;;  %v6153_v48 = vld [vmem:[#allocation8 + $0x278] ss:$12 sps:$4 sm:$0xff]   ;;  %v6150_v49 = vld [vmem:[#allocation8 + $0x30] ss:$12 sps:$4 sm:$0xff]  }
 0x211   :  { %2482 = vmatprep.subr.bf16.mxu0 %v6092_v51  ;;  %5529 = vmatprep.subr.bf16.mxu1 %v6093_v52  ;;  %v6154_v51 = vld [vmem:[#allocation8 + $0x1b8] ss:$12 sps:$4 sm:$0xff]   ;;  %v6158_v52 = vld [vmem:[#allocation8 + $0x290] ss:$12 sps:$4 sm:$0xff]  }
 0x214   :  { %2483 = vmatpush1.bf16.msra.mxu0 %v6090_v53  ;;  %5530 = vmatpush3.bf16.msra.mxu1 %v6094_v54  ;;  %v6155_v53 = vld [vmem:[#allocation8 + $0x48] ss:$12 sps:$4 sm:$0xff]   ;;  %v6162_v54 = vld [vmem:[#allocation8 + $0x64] ss:$12 sps:$4 sm:$0xff]  }
 0x215   :  { %2484 = vmatprep.subr.bf16.mxu0 %v6097_v55  ;;  %5531 = vmatprep.subr.bf16.mxu1 %v6098_v56  ;;  %v6163_v55 = vld [vmem:[#allocation8 + $0x2a8] ss:$12 sps:$4 sm:$0xff]   ;;  %v6160_v56 = vld [vmem:[#allocation8 + $0x60] ss:$12 sps:$4 sm:$0xff]  }
 0x218   :  { %2485 = vmatpush1.bf16.msra.mxu0 %v6095_v57  ;;  %5532 = vmatpush3.bf16.msra.mxu1 %v6099_v58  ;;  %v6164_v57 = vld [vmem:[#allocation8 + $0x1e8] ss:$12 sps:$4 sm:$0xff]  }
 0x219   :  { %2486 = vmatprep.subr.bf16.mxu0 %v6102_v59  ;;  %5539 = vmatprep.subr.bf16.mxu1 %v6103_v60  ;;  %v6167_v58 = vld [vmem:[#allocation8 + $0x7c] ss:$12 sps:$4 sm:$0xff]   ;;  %v6168_v59 = vld [vmem:[#allocation8 + $0x2c0] ss:$12 sps:$4 sm:$0xff]   ;;  %v6165_v60 = vld [vmem:[#allocation8 + $0x78] ss:$12 sps:$4 sm:$0xff]  }
 0x21b   :  { %2587 = vmatmul.mubr.bf16.vlgmr.msra.gmra.mrb[12].mxu1 %v6816_v20 }
 0x21c   :  { %2487 = vmatpush1.bf16.msra.mxu0 %v6100_v61  ;;  %5540 = vmatpush3.bf16.msra.mxu1 %v6104_v62  ;;  %v6169_v61 = vld [vmem:[#allocation8 + $0x200] ss:$12 sps:$4 sm:$0xff]  }
 0x21d   :  { %3225 = vmatprep.mubr.bf16.mxu1 %v6808_v45  ;;  %2488 = vmatprep.subr.bf16.mxu0 %v6107_v63  ;;  %v6172_v62 = vld [vmem:[#allocation8 + $0x94] ss:$12 sps:$4 sm:$0xff]   ;;  %v6173_v63 = vld [vmem:[#allocation8 + $0x2d8] ss:$12 sps:$4 sm:$0xff]  }
 0x21e   :  { %5541 = vmatprep.subr.bf16.mxu1 %v6108_v0  ;;  %v6170_v0 = vld [vmem:[#allocation8 + $0x90] ss:$12 sps:$4 sm:$0xff]  }
 0x220   :  { %2489 = vmatpush1.bf16.msra.mxu0 %v6105_v1  ;;  %5542 = vmatpush3.bf16.msra.mxu1 %v6109_v2  ;;  %v6174_v1 = vld [vmem:[#allocation8 + $0x218] ss:$12 sps:$4 sm:$0xff]  }
 0x221   :  { %2490 = vmatprep.subr.bf16.mxu0 %v6112_v3  ;;  %5543 = vmatprep.subr.bf16.mxu1 %v6113_v4  ;;  %v6177_v2 = vld [vmem:[#allocation8 + $0xac] ss:$12 sps:$4 sm:$0xff]   ;;  %v6178_v3 = vld [vmem:[#allocation8 + $0x2f0] ss:$12 sps:$4 sm:$0xff]   ;;  %v6175_v4 = vld [vmem:[#allocation8 + $0xa8] ss:$12 sps:$4 sm:$0xff]  }
 0x224   :  { %2491 = vmatpush1.bf16.msra.mxu0 %v6110_v5  ;;  %5544 = vmatpush3.bf16.msra.mxu1 %v6114_v6  ;;  %v6179_v5 = vld [vmem:[#allocation8 + $0x230] ss:$12 sps:$4 sm:$0xff]  }
 0x225   :  { %2492 = vmatprep.subr.bf16.mxu0 %v6117_v7  ;;  %5545 = vmatprep.subr.bf16.mxu1 %v6118_v13  ;;  %v6182_v6 = vld [vmem:[#allocation8 + $0xc4] ss:$12 sps:$4 sm:$0xff]   ;;  %v6185_v7 = vld [vmem:[#allocation5 + $0x24] ss:$48 sps:$4 sm:$0xff]   ;;  %v6180_v13 = vld [vmem:[#allocation8 + $0xc0] ss:$12 sps:$4 sm:$0xff]  }
 0x228   :  { %2493 = vmatpush1.bf16.msra.mxu0 %v6115_v14  ;;  %5546 = vmatpush3.bf16.msra.mxu1 %v6119_v15  ;;  %v6183_v14 = vld [vmem:[#allocation5 + $0x20] ss:$48 sps:$4 sm:$0xff]   ;;  %v6188_v15 = vld [vmem:[#allocation8 + $0xdc] ss:$12 sps:$4 sm:$0xff]  }
 0x229   :  { %2494 = vmatprep.subr.bf16.mxu0 %v6122_v17  ;;  %5547 = vmatprep.subr.bf16.mxu1 %v6123_v18  ;;  %v6191_v17 = vld [vmem:[#allocation5 + $0x84] ss:$48 sps:$4 sm:$0xff]  }
 0x22a   :  { %v6186_v18 = vld [vmem:[#allocation8 + $0xd8] ss:$12 sps:$4 sm:$0xff]  }
 0x22c   :  { %2495 = vmatpush1.bf16.msra.mxu0 %v6120_v19  ;;  %5548 = vmatpush3.bf16.msra.mxu1 %v6124_v21  ;;  %v6189_v19 = vld [vmem:[#allocation5 + $0x80] ss:$48 sps:$4 sm:$0xff]  }
 0x22d   :  { %2496 = vmatprep.subr.bf16.mxu0 %v6127_v22  ;;  %5549 = vmatprep.subr.bf16.mxu1 %v6128_v23  ;;  %v6194_v21 = vld [vmem:[#allocation8 + $0xf4] ss:$12 sps:$4 sm:$0xff]   ;;  %v6197_v22 = vld [vmem:[#allocation5 + $0xe4] ss:$48 sps:$4 sm:$0xff]   ;;  %v6192_v23 = vld [vmem:[#allocation8 + $0xf0] ss:$12 sps:$4 sm:$0xff]  }
 0x230   :  { %2497 = vmatpush1.bf16.msra.mxu0 %v6125_v24  ;;  %5550 = vmatpush3.bf16.msra.mxu1 %v6129_v25  ;;  %v6195_v24 = vld [vmem:[#allocation5 + $0xe0] ss:$48 sps:$4 sm:$0xff]   ;;  %v6200_v25 = vld [vmem:[#allocation8 + $0x10c] ss:$12 sps:$4 sm:$0xff]  }
 0x231   :  { %2498 = vmatprep.subr.bf16.mxu0 %v6132_v26  ;;  %5551 = vmatprep.subr.bf16.mxu1 %v6133_v27  ;;  %v6203_v26 = vld [vmem:[#allocation5 + $0x144] ss:$48 sps:$4 sm:$0xff]  }
 0x232   :  { %v6198_v27 = vld [vmem:[#allocation8 + $0x108] ss:$12 sps:$4 sm:$0xff]  }
 0x234   :  { %2499 = vmatpush1.bf16.msra.mxu0 %v6130_v28  ;;  %5552 = vmatpush3.bf16.msra.mxu1 %v6134_v29  ;;  %v6201_v28 = vld [vmem:[#allocation5 + $0x140] ss:$48 sps:$4 sm:$0xff]  }
 0x235   :  { %2500 = vmatprep.subr.bf16.mxu0 %v6137_v30  ;;  %5553 = vmatprep.subr.bf16.mxu1 %v6138_v31  ;;  %v6206_v29 = vld [vmem:[#allocation8 + $0x124] ss:$12 sps:$4 sm:$0xff]   ;;  %v6209_v30 = vld [vmem:[#allocation5 + $0x1a4] ss:$48 sps:$4 sm:$0xff]   ;;  %v6204_v31 = vld [vmem:[#allocation8 + $0x120] ss:$12 sps:$4 sm:$0xff]  }
 0x238   :  { %2501 = vmatpush1.bf16.msra.mxu0 %v6135_v32  ;;  %5554 = vmatpush3.bf16.msra.mxu1 %v6139_v33  ;;  %v6207_v32 = vld [vmem:[#allocation5 + $0x1a0] ss:$48 sps:$4 sm:$0xff]   ;;  %v6212_v33 = vld [vmem:[#allocation8 + $0x13c] ss:$12 sps:$4 sm:$0xff]  }
 0x239   :  { %3107 = vmatprep.subr.bf16.mxu0 %v6142_v34  ;;  %5561 = vmatprep.subr.bf16.mxu1 %v6143_v35  ;;  %v6215_v34 = vld [vmem:[#allocation5 + $0x204] ss:$48 sps:$4 sm:$0xff]  }
 0x23a   :  { %v6210_v35 = vld [vmem:[#allocation8 + $0x138] ss:$12 sps:$4 sm:$0xff]  }
 0x23b   :  { %2503 = vmatmul.mubr.bf16.vlgmr.msra.gmra.mrb[8].mxu0 %v6816_v20  ;;  %3226 = vmatmul.mubr.bf16.vlgmr.msra.gmra.mrb[16].mxu1 %v6804_v42  ;;  %v6157_v20 = vld [vmem:[#allocation8 + $0x4c] ss:$12 sps:$4 sm:$0xff]  }
 0x23c   :  { %3108 = vmatpush1.bf16.msra.mxu0 %v6140_v36  ;;  %3139 = vmatprep.mubr.bf16.mxu0 %v6808_v45  ;;  %v6159_v45 = vld [vmem:[#allocation8 + $0x1d0] ss:$12 sps:$4 sm:$0xff]   ;;  %v6213_v36 = vld [vmem:[#allocation5 + $0x200] ss:$48 sps:$4 sm:$0xff]  }
 0x23d   :  { %5562 = vmatpush3.bf16.msra.mxu1 %v6144_v37  ;;  %3266 = vmatprep.mubr.bf16.mxu1 %v6810_v46  ;;  %v6218_v37 = vld [vmem:[#allocation8 + $0x154] ss:$12 sps:$4 sm:$0xff]  }
 0x23e   :  { %3109 = vmatprep.subr.bf16.mxu0 %v6147_v38  ;;  %5563 = vmatprep.subr.bf16.mxu1 %v6148_v39  ;;  %v6221_v38 = vld [vmem:[#allocation5 + $0x264] ss:$48 sps:$4 sm:$0xff]   ;;  %v6216_v39 = vld [vmem:[#allocation8 + $0x150] ss:$12 sps:$4 sm:$0xff]  }
 0x240   :  { %3110 = vmatpush1.bf16.msra.mxu0 %v6145_v40  ;;  %v6219_v40 = vld [vmem:[#allocation5 + $0x260] ss:$48 sps:$4 sm:$0xff]  }
 0x241   :  { %5564 = vmatpush3.bf16.msra.mxu1 %v6149_v41  ;;  %3111 = vmatprep.subr.bf16.mxu0 %v6152_v47  ;;  %v6224_v41 = vld [vmem:[#allocation8 + $0x16c] ss:$12 sps:$4 sm:$0xff]  }
 0x242   :  { %5565 = vmatprep.subr.bf16.mxu1 %v6153_v48  ;;  %v6227_v47 = vld [vmem:[#allocation5 + $0x2c4] ss:$48 sps:$4 sm:$0xff]  }
 0x243   :  { %v6222_v48 = vld [vmem:[#allocation8 + $0x168] ss:$12 sps:$4 sm:$0xff]  }
 0x244   :  { %3112 = vmatpush1.bf16.msra.mxu0 %v6150_v49  ;;  %v6225_v49 = vld [vmem:[#allocation5 + $0x2c0] ss:$48 sps:$4 sm:$0xff]  }
 0x245   :  { %5566 = vmatpush3.bf16.msra.mxu1 %v6154_v51  ;;  %3113 = vmatprep.subr.bf16.mxu0 %v6157_v20  ;;  %v6230_v51 = vld [vmem:[#allocation8 + $0x184] ss:$12 sps:$4 sm:$0xff]   ;;  %v6233_v20 = vld [vmem:[#allocation5 + $0x324] ss:$48 sps:$4 sm:$0xff]  }
 0x246   :  { %5567 = vmatprep.subr.bf16.mxu1 %v6158_v52  ;;  %v6228_v52 = vld [vmem:[#allocation8 + $0x180] ss:$12 sps:$4 sm:$0xff]  }
 0x248   :  { %3114 = vmatpush1.bf16.msra.mxu0 %v6155_v53  ;;  %v6231_v53 = vld [vmem:[#allocation5 + $0x320] ss:$48 sps:$4 sm:$0xff]  }
 0x249   :  { %5568 = vmatpush3.bf16.msra.mxu1 %v6159_v45  ;;  %3115 = vmatprep.subr.bf16.mxu0 %v6162_v54  ;;  %v6236_v45 = vld [vmem:[#allocation8 + $0x19c] ss:$12 sps:$4 sm:$0xff]  }
 0x24a   :  { %5569 = vmatprep.subr.bf16.mxu1 %v6163_v55  ;;  %v6239_v54 = vld [vmem:[#allocation5 + $0x384] ss:$48 sps:$4 sm:$0xff]  }
 0x24b   :  { %v6234_v55 = vld [vmem:[#allocation8 + $0x198] ss:$12 sps:$4 sm:$0xff]  }
 0x24c   :  { %3116 = vmatpush1.bf16.msra.mxu0 %v6160_v56  ;;  %v6237_v56 = vld [vmem:[#allocation5 + $0x380] ss:$48 sps:$4 sm:$0xff]  }
 0x24d   :  { %5570 = vmatpush3.bf16.msra.mxu1 %v6164_v57  ;;  %3117 = vmatprep.subr.bf16.mxu0 %v6167_v58  ;;  %v6242_v57 = vld [vmem:[#allocation8 + $0x1b4] ss:$12 sps:$4 sm:$0xff]   ;;  %v6245_v58 = vld [vmem:[#allocation5 + $0x3e4] ss:$48 sps:$4 sm:$0xff]  }
 0x24e   :  { %5571 = vmatprep.subr.bf16.mxu1 %v6168_v59  ;;  %v6240_v59 = vld [vmem:[#allocation8 + $0x1b0] ss:$12 sps:$4 sm:$0xff]  }
 0x250   :  { %3118 = vmatpush1.bf16.msra.mxu0 %v6165_v60  ;;  %v6243_v60 = vld [vmem:[#allocation5 + $0x3e0] ss:$48 sps:$4 sm:$0xff]  }
 0x251   :  { %5572 = vmatpush3.bf16.msra.mxu1 %v6169_v61  ;;  %3119 = vmatprep.subr.bf16.mxu0 %v6172_v62  ;;  %v6248_v61 = vld [vmem:[#allocation8 + $0x1cc] ss:$12 sps:$4 sm:$0xff]  }
 0x252   :  { %5573 = vmatprep.subr.bf16.mxu1 %v6173_v63  ;;  %v6251_v62 = vld [vmem:[#allocation5 + $0x444] ss:$48 sps:$4 sm:$0xff]   ;;  %v6254_v63 = vld [vmem:[#allocation8 + $0x1e4] ss:$12 sps:$4 sm:$0xff]  }
 0x254   :  { %3120 = vmatpush1.bf16.msra.mxu0 %v6170_v0  ;;  %v6257_v0 = vld [vmem:[#allocation5 + $0x4a4] ss:$48 sps:$4 sm:$0xff]  }
 0x255   :  { %5574 = vmatpush3.bf16.msra.mxu1 %v6174_v1  ;;  %3121 = vmatprep.subr.bf16.mxu0 %v6177_v2  ;;  %v6252_v1 = vld [vmem:[#allocation8 + $0x1e0] ss:$12 sps:$4 sm:$0xff]   ;;  %v6255_v2 = vld [vmem:[#allocation5 + $0x4a0] ss:$48 sps:$4 sm:$0xff]  }
 0x256   :  { %5575 = vmatprep.subr.bf16.mxu1 %v6178_v3  ;;  %v6260_v3 = vld [vmem:[#allocation8 + $0x1fc] ss:$12 sps:$4 sm:$0xff]  }
 0x258   :  { %3122 = vmatpush1.bf16.msra.mxu0 %v6175_v4  ;;  %v6263_v4 = vld [vmem:[#allocation5 + $0x504] ss:$48 sps:$4 sm:$0xff]  }
 0x259   :  { %5576 = vmatpush3.bf16.msra.mxu1 %v6179_v5  ;;  %3123 = vmatprep.subr.bf16.mxu0 %v6182_v6  ;;  %v6258_v5 = vld [vmem:[#allocation8 + $0x1f8] ss:$12 sps:$4 sm:$0xff]  }
 0x25a   :  { %3873 = vmatprep.subr.bf16.mxu1 %v6185_v7  ;;  %v6261_v6 = vld [vmem:[#allocation5 + $0x500] ss:$48 sps:$4 sm:$0xff]  }
 0x25b   :  { %v6266_v7 = vld [vmem:[#allocation8 + $0x214] ss:$12 sps:$4 sm:$0xff]  }
 0x25c   :  { %3267 = vmatmul.mubr.bf16.vlgmr.msra.gmra.mrb[20].mxu1 %v6806_v44  ;;  %3124 = vmatpush1.bf16.msra.mxu0 %v6180_v13  ;;  %v6269_v13 = vld [vmem:[#allocation5 + $0x564] ss:$48 sps:$4 sm:$0xff]  }
 0x25d   :  { %3874 = vmatpush1.bf16.msra.mxu1 %v6183_v14  ;;  %3125 = vmatprep.subr.bf16.mxu0 %v6188_v15  ;;  %v6264_v14 = vld [vmem:[#allocation8 + $0x210] ss:$12 sps:$4 sm:$0xff]   ;;  %v6267_v15 = vld [vmem:[#allocation5 + $0x560] ss:$48 sps:$4 sm:$0xff]  }
 0x25e   :  { %3875 = vmatprep.subr.bf16.mxu1 %v6191_v17  ;;  %3905 = vmatprep.mubr.bf16.mxu1 %v6770_v50  ;;  %v6272_v17 = vld [vmem:[#allocation8 + $0x22c] ss:$12 sps:$4 sm:$0xff]  }
 0x260   :  { %3126 = vmatpush1.bf16.msra.mxu0 %v6186_v18  ;;  %v6275_v18 = vld [vmem:[#allocation5 + $0x5c4] ss:$48 sps:$4 sm:$0xff]  }
 0x261   :  { %3876 = vmatpush1.bf16.msra.mxu1 %v6189_v19  ;;  %3127 = vmatprep.subr.bf16.mxu0 %v6194_v21  ;;  %v6270_v19 = vld [vmem:[#allocation8 + $0x228] ss:$12 sps:$4 sm:$0xff]  }
 0x262   :  { %3877 = vmatprep.subr.bf16.mxu1 %v6197_v22  ;;  %v6273_v21 = vld [vmem:[#allocation5 + $0x5c0] ss:$48 sps:$4 sm:$0xff]  }
 0x263   :  { %v6278_v22 = vld [vmem:[#allocation8 + $0x244] ss:$12 sps:$4 sm:$0xff]  }
 0x264   :  { %3128 = vmatpush1.bf16.msra.mxu0 %v6192_v23  ;;  %v6281_v23 = vld [vmem:[#allocation5 + $0x624] ss:$48 sps:$4 sm:$0xff]  }
 0x265   :  { %3878 = vmatpush1.bf16.msra.mxu1 %v6195_v24  ;;  %3129 = vmatprep.subr.bf16.mxu0 %v6200_v25  ;;  %v6276_v24 = vld [vmem:[#allocation8 + $0x240] ss:$12 sps:$4 sm:$0xff]   ;;  %v6279_v25 = vld [vmem:[#allocation5 + $0x620] ss:$48 sps:$4 sm:$0xff]  }
 0x266   :  { %3879 = vmatprep.subr.bf16.mxu1 %v6203_v26  ;;  %v6284_v26 = vld [vmem:[#allocation8 + $0x25c] ss:$12 sps:$4 sm:$0xff]  }
 0x268   :  { %3130 = vmatpush1.bf16.msra.mxu0 %v6198_v27  ;;  %v6287_v27 = vld [vmem:[#allocation5 + $0x684] ss:$48 sps:$4 sm:$0xff]  }
 0x269   :  { %3880 = vmatpush1.bf16.msra.mxu1 %v6201_v28  ;;  %3131 = vmatprep.subr.bf16.mxu0 %v6206_v29  ;;  %v6282_v28 = vld [vmem:[#allocation8 + $0x258] ss:$12 sps:$4 sm:$0xff]  }
 0x26a   :  { %3881 = vmatprep.subr.bf16.mxu1 %v6209_v30  ;;  %v6285_v29 = vld [vmem:[#allocation5 + $0x680] ss:$48 sps:$4 sm:$0xff]  }
 0x26b   :  { %v6290_v30 = vld [vmem:[#allocation8 + $0x274] ss:$12 sps:$4 sm:$0xff]  }
 0x26c   :  { %3132 = vmatpush1.bf16.msra.mxu0 %v6204_v31  ;;  %v6293_v31 = vld [vmem:[#allocation5 + $0x6e4] ss:$48 sps:$4 sm:$0xff]  }
 0x26d   :  { %3882 = vmatpush1.bf16.msra.mxu1 %v6207_v32  ;;  %3133 = vmatprep.subr.bf16.mxu0 %v6212_v33  ;;  %v6288_v32 = vld [vmem:[#allocation8 + $0x270] ss:$12 sps:$4 sm:$0xff]   ;;  %v6291_v33 = vld [vmem:[#allocation5 + $0x6e0] ss:$48 sps:$4 sm:$0xff]  }
 0x26e   :  { %3883 = vmatprep.subr.bf16.mxu1 %v6215_v34  ;;  %v6296_v34 = vld [vmem:[#allocation8 + $0x28c] ss:$12 sps:$4 sm:$0xff]  }
 0x270   :  { %3134 = vmatpush1.bf16.msra.mxu0 %v6210_v35  ;;  %v6299_v35 = vld [vmem:[#allocation5 + $0x744] ss:$48 sps:$4 sm:$0xff]  }
 0x271   :  { %3884 = vmatpush1.bf16.msra.mxu1 %v6213_v36  ;;  %3135 = vmatprep.subr.bf16.mxu0 %v6218_v37  ;;  %v6294_v36 = vld [vmem:[#allocation8 + $0x288] ss:$12 sps:$4 sm:$0xff]  }
 0x272   :  { %3885 = vmatprep.subr.bf16.mxu1 %v6221_v38  ;;  %v6297_v37 = vld [vmem:[#allocation5 + $0x740] ss:$48 sps:$4 sm:$0xff]  }
 0x273   :  { %v6302_v38 = vld [vmem:[#allocation8 + $0x2a4] ss:$12 sps:$4 sm:$0xff]  }
 0x274   :  { %3136 = vmatpush1.bf16.msra.mxu0 %v6216_v39  ;;  %v6305_v39 = vld [vmem:[#allocation5 + $0x7a4] ss:$48 sps:$4 sm:$0xff]  }
 0x275   :  { %3886 = vmatpush1.bf16.msra.mxu1 %v6219_v40  ;;  %3137 = vmatprep.subr.bf16.mxu0 %v6224_v41  ;;  %v6300_v40 = vld [vmem:[#allocation8 + $0x2a0] ss:$12 sps:$4 sm:$0xff]   ;;  %v6303_v41 = vld [vmem:[#allocation5 + $0x7a0] ss:$48 sps:$4 sm:$0xff]  }
 0x276   :  { %3887 = vmatprep.subr.bf16.mxu1 %v6227_v47  ;;  %v6308_v47 = vld [vmem:[#allocation8 + $0x2bc] ss:$12 sps:$4 sm:$0xff]  }
 0x278   :  { %3138 = vmatpush1.bf16.msra.mxu0 %v6222_v48  ;;  %v6311_v48 = vld [vmem:[#allocation5 + $0x804] ss:$48 sps:$4 sm:$0xff]  }
 0x279   :  { %3888 = vmatpush1.bf16.msra.mxu1 %v6225_v49  ;;  %3150 = vmatprep.subr.bf16.mxu0 %v6230_v51  ;;  %v6306_v49 = vld [vmem:[#allocation8 + $0x2b8] ss:$12 sps:$4 sm:$0xff]  }
 0x27a   :  { %3889 = vmatprep.subr.bf16.mxu1 %v6233_v20  ;;  %v6309_v51 = vld [vmem:[#allocation5 + $0x800] ss:$48 sps:$4 sm:$0xff]  }
 0x27b   :  { %3140 = vmatmul.mubr.bf16.vlgmr.msra.gmra.mrb[8].mxu0 %v6804_v42  ;;  %v6246_v42 = vld [vmem:[#allocation8 + $0x1c8] ss:$12 sps:$4 sm:$0xff]  }
 0x27c   :  { %3151 = vmatpush1.bf16.msra.mxu0 %v6228_v52  ;;  %3182 = vmatprep.mubr.bf16.mxu0 %v6810_v46  ;;  %v6249_v46 = vld [vmem:[#allocation5 + $0x440] ss:$48 sps:$4 sm:$0xff]   ;;  %v6317_v52 = vld [vmem:[#allocation5 + $0x864] ss:$48 sps:$4 sm:$0xff]  }
 0x27d   :  { %3890 = vmatpush1.bf16.msra.mxu1 %v6231_v53  ;;  %3152 = vmatprep.subr.bf16.mxu0 %v6236_v45  ;;  %v6314_v20 = vld [vmem:[#allocation8 + $0x2d4] ss:$12 sps:$4 sm:$0xff]   ;;  %v6312_v53 = vld [vmem:[#allocation8 + $0x2d0] ss:$12 sps:$4 sm:$0xff]  }
 0x27e   :  { %3891 = vmatprep.subr.bf16.mxu1 %v6239_v54  ;;  %v6315_v45 = vld [vmem:[#allocation5 + $0x860] ss:$48 sps:$4 sm:$0xff]   ;;  %v6320_v54 = vld [vmem:[#allocation8 + $0x2ec] ss:$12 sps:$4 sm:$0xff]  }
 0x280   :  { %3153 = vmatpush1.bf16.msra.mxu0 %v6234_v55  ;;  %v6323_v55 = vld [vmem:[#allocation5 + $0x8c4] ss:$48 sps:$4 sm:$0xff]  }
 0x281   :  { %3892 = vmatpush1.bf16.msra.mxu1 %v6237_v56  ;;  %3154 = vmatprep.subr.bf16.mxu0 %v6242_v57  ;;  %v6318_v56 = vld [vmem:[#allocation8 + $0x2e8] ss:$12 sps:$4 sm:$0xff]  }
 0x282   :  { %3893 = vmatprep.subr.bf16.mxu1 %v6245_v58  ;;  %v6321_v57 = vld [vmem:[#allocation5 + $0x8c0] ss:$48 sps:$4 sm:$0xff]  }
 0x283   :  { %v6398_v58 = vld [vmem:[#allocation8 + $0x604] ss:$12 sps:$4 sm:$0xff]  }
 0x284   :  { %3155 = vmatpush1.bf16.msra.mxu0 %v6240_v59  ;;  %v6326_v59 = vld [vmem:[#allocation5 + $0x2c] ss:$48 sps:$4 sm:$0xff]  }
 0x285   :  { %3894 = vmatpush1.bf16.msra.mxu1 %v6243_v60  ;;  %3156 = vmatprep.subr.bf16.mxu0 %v6248_v61  ;;  %v6396_v60 = vld [vmem:[#allocation8 + $0x600] ss:$12 sps:$4 sm:$0xff]  }
 0x286   :  { %3895 = vmatprep.subr.bf16.mxu1 %v6251_v62  ;;  %v6324_v61 = vld [vmem:[#allocation5 + $0x28] ss:$48 sps:$4 sm:$0xff]   ;;  %v6329_v62 = vld [vmem:[#allocation5 + $0x8c] ss:$48 sps:$4 sm:$0xff]  }
 0x288   :  { %3157 = vmatpush1.bf16.msra.mxu0 %v6246_v42  ;;  %v6401_v42 = vld [vmem:[#allocation8 + $0x61c] ss:$12 sps:$4 sm:$0xff]  }
 0x289   :  { %3896 = vmatpush1.bf16.msra.mxu1 %v6249_v46  ;;  %3158 = vmatprep.subr.bf16.mxu0 %v6254_v63  ;;  %v6399_v46 = vld [vmem:[#allocation8 + $0x618] ss:$12 sps:$4 sm:$0xff]   ;;  %v6327_v63 = vld [vmem:[#allocation5 + $0x88] ss:$48 sps:$4 sm:$0xff]  }
 0x28a   :  { %3897 = vmatprep.subr.bf16.mxu1 %v6257_v0  ;;  %v6404_v0 = vld [vmem:[#allocation8 + $0x634] ss:$12 sps:$4 sm:$0xff]  }
 0x28c   :  { %3159 = vmatpush1.bf16.msra.mxu0 %v6252_v1  ;;  %v6332_v1 = vld [vmem:[#allocation5 + $0xec] ss:$48 sps:$4 sm:$0xff]  }
 0x28d   :  { %3898 = vmatpush1.bf16.msra.mxu1 %v6255_v2  ;;  %3160 = vmatprep.subr.bf16.mxu0 %v6260_v3  ;;  %v6402_v2 = vld [vmem:[#allocation8 + $0x630] ss:$12 sps:$4 sm:$0xff]  }
 0x28e   :  { %3899 = vmatprep.subr.bf16.mxu1 %v6263_v4  ;;  %v6330_v3 = vld [vmem:[#allocation5 + $0xe8] ss:$48 sps:$4 sm:$0xff]  }
 0x28f   :  { %v6407_v4 = vld [vmem:[#allocation8 + $0x64c] ss:$12 sps:$4 sm:$0xff]  }
 0x290   :  { %3161 = vmatpush1.bf16.msra.mxu0 %v6258_v5  ;;  %v6405_v5 = vld [vmem:[#allocation8 + $0x648] ss:$12 sps:$4 sm:$0xff]  }
 0x291   :  { %3900 = vmatpush1.bf16.msra.mxu1 %v6261_v6  ;;  %3162 = vmatprep.subr.bf16.mxu0 %v6266_v7  ;;  %v6333_v6 = vld [vmem:[#allocation5 + $0x148] ss:$48 sps:$4 sm:$0xff]   ;;  %v6410_v7 = vld [vmem:[#allocation8 + $0x664] ss:$12 sps:$4 sm:$0xff]  }
 0x292   :  { %3901 = vmatprep.subr.bf16.mxu1 %v6269_v13  ;;  %v6408_v13 = vld [vmem:[#allocation8 + $0x660] ss:$12 sps:$4 sm:$0xff]  }
 0x294   :  { %3163 = vmatpush1.bf16.msra.mxu0 %v6264_v14  ;;  %v6336_v14 = vld [vmem:[#allocation5 + $0x1a8] ss:$48 sps:$4 sm:$0xff]  }
 0x295   :  { %3902 = vmatpush1.bf16.msra.mxu1 %v6267_v15  ;;  %3164 = vmatprep.subr.bf16.mxu0 %v6272_v17  ;;  %v6413_v15 = vld [vmem:[#allocation8 + $0x67c] ss:$12 sps:$4 sm:$0xff]   ;;  %v6341_v17 = vld [vmem:[#allocation5 + $0x20c] ss:$48 sps:$4 sm:$0xff]  }
 0x296   :  { %3903 = vmatprep.subr.bf16.mxu1 %v6275_v18  ;;  %v6411_v18 = vld [vmem:[#allocation8 + $0x678] ss:$12 sps:$4 sm:$0xff]  }
 0x298   :  { %3165 = vmatpush1.bf16.msra.mxu0 %v6270_v19  ;;  %v6339_v19 = vld [vmem:[#allocation5 + $0x208] ss:$48 sps:$4 sm:$0xff]  }
 0x299   :  { %3904 = vmatpush1.bf16.msra.mxu1 %v6273_v21  ;;  %3166 = vmatprep.subr.bf16.mxu0 %v6278_v22  ;;  %v6416_v21 = vld [vmem:[#allocation8 + $0x694] ss:$12 sps:$4 sm:$0xff]  }
 0x29a   :  { %3916 = vmatprep.subr.bf16.mxu1 %v6281_v23  ;;  %v6344_v23 = vld [vmem:[#allocation5 + $0x26c] ss:$48 sps:$4 sm:$0xff]  }
 0x29c   :  { %3167 = vmatpush1.bf16.msra.mxu0 %v6276_v24  ;;  %3906 = vmatmul.mubr.bf16.vlgmr.msra.gmra.mrb[24].mxu1 %v6774_v8 }
 0x29d   :  { %3917 = vmatpush1.bf16.msra.mxu1 %v6279_v25  ;;  %3168 = vmatprep.subr.bf16.mxu0 %v6284_v26 }
 0x29e   :  { %3918 = vmatprep.subr.bf16.mxu1 %v6287_v27  ;;  %3948 = vmatprep.mubr.bf16.mxu1 %v6675_v16  ;;  %v6414_v27 = vld [vmem:[#allocation8 + $0x690] ss:$12 sps:$4 sm:$0xff]  }
 0x2a0   :  { %3169 = vmatpush1.bf16.msra.mxu0 %v6282_v28 }
 0x2a1   :  { %3919 = vmatpush1.bf16.msra.mxu1 %v6285_v29  ;;  %3170 = vmatprep.subr.bf16.mxu0 %v6290_v30  ;;  %v6342_v29 = vld [vmem:[#allocation5 + $0x268] ss:$48 sps:$4 sm:$0xff]  }
 0x2a2   :  { %3920 = vmatprep.subr.bf16.mxu1 %v6293_v31  ;;  %v6419_v30 = vld [vmem:[#allocation8 + $0x6ac] ss:$12 sps:$4 sm:$0xff]  }
 0x2a4   :  { %3171 = vmatpush1.bf16.msra.mxu0 %v6288_v32  ;;  %v6347_v32 = vld [vmem:[#allocation5 + $0x2cc] ss:$48 sps:$4 sm:$0xff]  }
 0x2a5   :  { %3921 = vmatpush1.bf16.msra.mxu1 %v6291_v33  ;;  %3172 = vmatprep.subr.bf16.mxu0 %v6296_v34  ;;  %v6417_v33 = vld [vmem:[#allocation8 + $0x6a8] ss:$12 sps:$4 sm:$0xff]   ;;  %v6345_v34 = vld [vmem:[#allocation5 + $0x2c8] ss:$48 sps:$4 sm:$0xff]  }
 0x2a6   :  { %3922 = vmatprep.subr.bf16.mxu1 %v6299_v35  ;;  %v6422_v35 = vld [vmem:[#allocation8 + $0x6c4] ss:$12 sps:$4 sm:$0xff]  }
 0x2a8   :  { %3173 = vmatpush1.bf16.msra.mxu0 %v6294_v36  ;;  %v6350_v36 = vld [vmem:[#allocation5 + $0x32c] ss:$48 sps:$4 sm:$0xff]  }
 0x2a9   :  { %3923 = vmatpush1.bf16.msra.mxu1 %v6297_v37  ;;  %3174 = vmatprep.subr.bf16.mxu0 %v6302_v38  ;;  %v6420_v37 = vld [vmem:[#allocation8 + $0x6c0] ss:$12 sps:$4 sm:$0xff]  }
 0x2aa   :  { %3924 = vmatprep.subr.bf16.mxu1 %v6305_v39  ;;  %v6348_v38 = vld [vmem:[#allocation5 + $0x328] ss:$48 sps:$4 sm:$0xff]  }
 0x2ab   :  { %v6427_v39 = vld [vmem:[#allocation8 + $0x6dc] ss:$12 sps:$4 sm:$0xff]  }
 0x2ac   :  { %3175 = vmatpush1.bf16.msra.mxu0 %v6300_v40  ;;  %v6353_v40 = vld [vmem:[#allocation5 + $0x38c] ss:$48 sps:$4 sm:$0xff]  }
 0x2ad   :  { %3925 = vmatpush1.bf16.msra.mxu1 %v6303_v41  ;;  %3176 = vmatprep.subr.bf16.mxu0 %v6308_v47  ;;  %v6425_v41 = vld [vmem:[#allocation8 + $0x6d8] ss:$12 sps:$4 sm:$0xff]   ;;  %v6351_v47 = vld [vmem:[#allocation5 + $0x388] ss:$48 sps:$4 sm:$0xff]  }
 0x2ae   :  { %3926 = vmatprep.subr.bf16.mxu1 %v6311_v48  ;;  %v6432_v48 = vld [vmem:[#allocation8 + $0x6f4] ss:$12 sps:$4 sm:$0xff]  }
 0x2b0   :  { %3177 = vmatpush1.bf16.msra.mxu0 %v6306_v49  ;;  %v6356_v49 = vld [vmem:[#allocation5 + $0x3ec] ss:$48 sps:$4 sm:$0xff]  }
 0x2b1   :  { %3927 = vmatpush1.bf16.msra.mxu1 %v6309_v51  ;;  %3178 = vmatprep.subr.bf16.mxu0 %v6314_v20  ;;  %v6430_v51 = vld [vmem:[#allocation8 + $0x6f0] ss:$12 sps:$4 sm:$0xff]  }
 0x2b2   :  { %3928 = vmatprep.subr.bf16.mxu1 %v6317_v52  ;;  %v6354_v20 = vld [vmem:[#allocation5 + $0x3e8] ss:$48 sps:$4 sm:$0xff]  }
 0x2b3   :  { %v6437_v52 = vld [vmem:[#allocation8 + $0x70c] ss:$12 sps:$4 sm:$0xff]  }
 0x2b4   :  { %3179 = vmatpush1.bf16.msra.mxu0 %v6312_v53  ;;  %v6359_v53 = vld [vmem:[#allocation5 + $0x44c] ss:$48 sps:$4 sm:$0xff]  }
 0x2b5   :  { %3929 = vmatpush1.bf16.msra.mxu1 %v6315_v45  ;;  %3180 = vmatprep.subr.bf16.mxu0 %v6320_v54  ;;  %v6435_v45 = vld [vmem:[#allocation8 + $0x708] ss:$12 sps:$4 sm:$0xff]   ;;  %v6357_v54 = vld [vmem:[#allocation5 + $0x448] ss:$48 sps:$4 sm:$0xff]  }
 0x2b6   :  { %3930 = vmatprep.subr.bf16.mxu1 %v6323_v55  ;;  %v6442_v55 = vld [vmem:[#allocation8 + $0x724] ss:$12 sps:$4 sm:$0xff]  }
 0x2b8   :  { %3181 = vmatpush1.bf16.msra.mxu0 %v6318_v56  ;;  %v6362_v56 = vld [vmem:[#allocation5 + $0x4ac] ss:$48 sps:$4 sm:$0xff]  }
 0x2b9   :  { %3931 = vmatpush1.bf16.msra.mxu1 %v6321_v57  ;;  %4697 = vmatprep.subr.bf16.mxu0 %v6398_v58  ;;  %v6440_v57 = vld [vmem:[#allocation8 + $0x720] ss:$12 sps:$4 sm:$0xff]  }
 0x2ba   :  { %3959 = vmatprep.subr.bf16.mxu1 %v6326_v59  ;;  %v6360_v58 = vld [vmem:[#allocation5 + $0x4a8] ss:$48 sps:$4 sm:$0xff]  }
 0x2bb   :  { %3183 = vmatmul.mubr.bf16.vlgmr.msra.gmra.mrb[8].mxu0 %v6806_v44  ;;  %v6335_v44 = vld [vmem:[#allocation5 + $0x14c] ss:$48 sps:$4 sm:$0xff]   ;;  %v6447_v59 = vld [vmem:[#allocation8 + $0x73c] ss:$12 sps:$4 sm:$0xff]  }
 0x2bc   :  { %3949 = vmatmul.mubr.bf16.vlgmr.msra.gmra.mrb[24].mxu1 %v6780_v43  ;;  %4698 = vmatpush1.bf16.msra.mxu0 %v6396_v60  ;;  %v6365_v60 = vld [vmem:[#allocation5 + $0x50c] ss:$48 sps:$4 sm:$0xff]  }
 0x2bd   :  { %3960 = vmatpush1.bf16.msra.mxu1 %v6324_v61  ;;  %3991 = vmatprep.mubr.bf16.mxu1 %v6770_v50  ;;  %v6338_v50 = vld [vmem:[#allocation5 + $0x1ac] ss:$48 sps:$4 sm:$0xff]   ;;  %v6445_v61 = vld [vmem:[#allocation8 + $0x738] ss:$12 sps:$4 sm:$0xff]  }
 0x2be   :  { %3961 = vmatprep.subr.bf16.mxu1 %v6329_v62  ;;  %4699 = vmatprep.subr.bf16.mxu0 %v6401_v42  ;;  %v6363_v62 = vld [vmem:[#allocation5 + $0x508] ss:$48 sps:$4 sm:$0xff]  }
 0x2c0   :  { %4700 = vmatpush1.bf16.msra.mxu0 %v6399_v46  ;;  %v6368_v46 = vld [vmem:[#allocation5 + $0x56c] ss:$48 sps:$4 sm:$0xff]  }
 0x2c1   :  { %3962 = vmatpush1.bf16.msra.mxu1 %v6327_v63  ;;  %4701 = vmatprep.subr.bf16.mxu0 %v6404_v0 }
 0x2c2   :  { %3963 = vmatprep.subr.bf16.mxu1 %v6332_v1 }
 0x2c4   :  { %4702 = vmatpush1.bf16.msra.mxu0 %v6402_v2 }
 0x2c5   :  { %3964 = vmatpush1.bf16.msra.mxu1 %v6330_v3  ;;  %4703 = vmatprep.subr.bf16.mxu0 %v6407_v4  ;;  %v6366_v3 = vld [vmem:[#allocation5 + $0x568] ss:$48 sps:$4 sm:$0xff]  }
 0x2c6   :  { %3965 = vmatprep.subr.bf16.mxu1 %v6335_v44 }
 0x2c8   :  { %4704 = vmatpush1.bf16.msra.mxu0 %v6405_v5  ;;  %v6371_v5 = vld [vmem:[#allocation5 + $0x5cc] ss:$48 sps:$4 sm:$0xff]  }
 0x2c9   :  { %3966 = vmatpush1.bf16.msra.mxu1 %v6333_v6  ;;  %4705 = vmatprep.subr.bf16.mxu0 %v6410_v7  ;;  %v6369_v7 = vld [vmem:[#allocation5 + $0x5c8] ss:$48 sps:$4 sm:$0xff]  }
 0x2ca   :  { %3967 = vmatprep.subr.bf16.mxu1 %v6338_v50  ;;  %v6374_v50 = vld [vmem:[#allocation5 + $0x62c] ss:$48 sps:$4 sm:$0xff]  }
 0x2cc   :  { %4706 = vmatpush1.bf16.msra.mxu0 %v6408_v13  ;;  %v6372_v13 = vld [vmem:[#allocation5 + $0x628] ss:$48 sps:$4 sm:$0xff]  }
 0x2cd   :  { %3968 = vmatpush1.bf16.msra.mxu1 %v6336_v14  ;;  %4707 = vmatprep.subr.bf16.mxu0 %v6413_v15  ;;  %v6377_v14 = vld [vmem:[#allocation5 + $0x68c] ss:$48 sps:$4 sm:$0xff]   ;;  %v6375_v15 = vld [vmem:[#allocation5 + $0x688] ss:$48 sps:$4 sm:$0xff]  }
 0x2ce   :  { %v5511_v22 = vpop.f32.mrb[8].mxu1  ;;  %3969 = vmatprep.subr.bf16.mxu1 %v6341_v17  ;;  %v6380_v17 = vld [vmem:[#allocation5 + $0x6ec] ss:$48 sps:$4 sm:$0xff]  }
 0x2cf   :  { %v5512_v24 = vpop.f32.mrb[9].mxu1 }
 0x2d0   :  { %v6833_v25 = vadd.f32 %v5512_v24, %v5511_v22  ;;  %v5514_v26 = vpop.f32.mrb[10].mxu1  ;;  %4708 = vmatpush1.bf16.msra.mxu0 %v6411_v18  ;;  %v6378_v18 = vld [vmem:[#allocation5 + $0x6e8] ss:$48 sps:$4 sm:$0xff]   ;;  %v6386_v22 = vld [vmem:[#allocation5 + $0x7ac] ss:$48 sps:$4 sm:$0xff]  }
 0x2d1   :  { %3970 = vmatpush1.bf16.msra.mxu1 %v6339_v19  ;;  %v5515_v28 = vpop.f32.mrb[11].mxu1  ;;  %4709 = vmatprep.subr.bf16.mxu0 %v6416_v21  ;;  %v6383_v19 = vld [vmem:[#allocation5 + $0x74c] ss:$48 sps:$4 sm:$0xff]   ;;  %v6381_v21 = vld [vmem:[#allocation5 + $0x748] ss:$48 sps:$4 sm:$0xff]  }
 0x2d2   :  { %v6835_v31 = vadd.f32 %v5515_v28, %v5514_v26  ;;  %3971 = vmatprep.subr.bf16.mxu1 %v6344_v23  ;;  %v6384_v23 = vld [vmem:[#allocation5 + $0x7a8] ss:$48 sps:$4 sm:$0xff]   ;;  %v6389_v24 = vld [vmem:[#allocation5 + $0x80c] ss:$48 sps:$4 sm:$0xff]  }
 0x2d3   :  { %v6392_v26 = vld [vmem:[#allocation5 + $0x86c] ss:$48 sps:$4 sm:$0xff]  }
 0x2d4   :  { %4710 = vmatpush1.bf16.msra.mxu0 %v6414_v27 }
 0x2d5   :  { %3972 = vmatpush1.bf16.msra.mxu1 %v6342_v29  ;;  %4711 = vmatprep.subr.bf16.mxu0 %v6419_v30  ;;  %v6452_v29 = vld [vmem:[#allocation8 + $0x754] ss:$12 sps:$4 sm:$0xff]  }
 0x2d6   :  { %3973 = vmatprep.subr.bf16.mxu1 %v6347_v32  ;;  %v6450_v32 = vld [vmem:[#allocation8 + $0x750] ss:$12 sps:$4 sm:$0xff]  }
 0x2d8   :  { %4712 = vmatpush1.bf16.msra.mxu0 %v6417_v33 }
 0x2d9   :  { %3974 = vmatpush1.bf16.msra.mxu1 %v6345_v34  ;;  %4713 = vmatprep.subr.bf16.mxu0 %v6422_v35  ;;  %v6395_v35 = vld [vmem:[#allocation5 + $0x8cc] ss:$48 sps:$4 sm:$0xff]  }
 0x2da   :  { %3975 = vmatprep.subr.bf16.mxu1 %v6350_v36 }
 0x2dc   :  { %4714 = vmatpush1.bf16.msra.mxu0 %v6420_v37  ;;  %v6457_v37 = vld [vmem:[#allocation8 + $0x76c] ss:$12 sps:$4 sm:$0xff]  }
 0x2dd   :  { %3976 = vmatpush1.bf16.msra.mxu1 %v6348_v38  ;;  %4715 = vmatprep.subr.bf16.mxu0 %v6427_v39  ;;  %v6393_v38 = vld [vmem:[#allocation5 + $0x8c8] ss:$48 sps:$4 sm:$0xff]   ;;  %v6455_v39 = vld [vmem:[#allocation8 + $0x768] ss:$12 sps:$4 sm:$0xff]  }
 0x2de   :  { %3977 = vmatprep.subr.bf16.mxu1 %v6353_v40  ;;  %v6423_v40 = vld [vmem:[#allocation8 + $0x6c8] ss:$12 sps:$4 sm:$0xff]  }
 0x2e0   :  { %4716 = vmatpush1.bf16.msra.mxu0 %v6425_v41  ;;  %v6424_v41 = vld [vmem:[#allocation8 + $0x608] ss:$12 sps:$4 sm:$0xff]  }
 0x2e1   :  { %3978 = vmatpush1.bf16.msra.mxu1 %v6351_v47  ;;  %4717 = vmatprep.subr.bf16.mxu0 %v6432_v48  ;;  %v6428_v47 = vld [vmem:[#allocation8 + $0x6e0] ss:$12 sps:$4 sm:$0xff]   ;;  %v6462_v48 = vld [vmem:[#allocation8 + $0x784] ss:$12 sps:$4 sm:$0xff]  }
 0x2e2   :  { %3979 = vmatprep.subr.bf16.mxu1 %v6356_v49  ;;  %v6429_v49 = vld [vmem:[#allocation8 + $0x620] ss:$12 sps:$4 sm:$0xff]  }
 0x2e4   :  { %4718 = vmatpush1.bf16.msra.mxu0 %v6430_v51  ;;  %v6433_v51 = vld [vmem:[#allocation8 + $0x6f8] ss:$12 sps:$4 sm:$0xff]  }
 0x2e5   :  { %3980 = vmatpush1.bf16.msra.mxu1 %v6354_v20  ;;  %4719 = vmatprep.subr.bf16.mxu0 %v6437_v52  ;;  %v6434_v20 = vld [vmem:[#allocation8 + $0x638] ss:$12 sps:$4 sm:$0xff]   ;;  %v6438_v52 = vld [vmem:[#allocation8 + $0x710] ss:$12 sps:$4 sm:$0xff]  }
 0x2e6   :  { %3981 = vmatprep.subr.bf16.mxu1 %v6359_v53  ;;  %v6439_v53 = vld [vmem:[#allocation8 + $0x650] ss:$12 sps:$4 sm:$0xff]  }
 0x2e8   :  { %4720 = vmatpush1.bf16.msra.mxu0 %v6435_v45  ;;  %v6443_v45 = vld [vmem:[#allocation8 + $0x728] ss:$12 sps:$4 sm:$0xff]  }
 0x2e9   :  { %3982 = vmatpush1.bf16.msra.mxu1 %v6357_v54  ;;  %4721 = vmatprep.subr.bf16.mxu0 %v6442_v55  ;;  %v6444_v54 = vld [vmem:[#allocation8 + $0x668] ss:$12 sps:$4 sm:$0xff]   ;;  %v6448_v55 = vld [vmem:[#allocation8 + $0x740] ss:$12 sps:$4 sm:$0xff]  }
 0x2ea   :  { %3983 = vmatprep.subr.bf16.mxu1 %v6362_v56  ;;  %v6449_v56 = vld [vmem:[#allocation8 + $0x680] ss:$12 sps:$4 sm:$0xff]  }
 0x2ec   :  { %4722 = vmatpush1.bf16.msra.mxu0 %v6440_v57 }
 0x2ed   :  { %3984 = vmatpush1.bf16.msra.mxu1 %v6360_v58  ;;  %4723 = vmatprep.subr.bf16.mxu0 %v6447_v59 }
 0x2ee   :  { %v5533_v42 = vpop.f32.mrb[12].mxu1  ;;  %3985 = vmatprep.subr.bf16.mxu1 %v6365_v60 }
 0x2ef   :  { %v5534_v63 = vpop.f32.mrb[13].mxu1 }
 0x2f0   :  { %v5535_v0 = vadd.f32 %v5534_v63, %v5533_v42  ;;  %v5536_v1 = vpop.f32.mrb[14].mxu1  ;;  %4724 = vmatpush1.bf16.msra.mxu0 %v6445_v61  ;;  %v6454_v61 = vld [vmem:[#allocation8 + $0x698] ss:$12 sps:$4 sm:$0xff]   ;;  %v6458_v42 = vld [vmem:[#allocation8 + $0x770] ss:$12 sps:$4 sm:$0xff]  }
 0x2f1   :  { %3986 = vmatpush1.bf16.msra.mxu1 %v6363_v62  ;;  %v5537_v2 = vpop.f32.mrb[15].mxu1  ;;  %4725 = vmatprep.subr.bf16.mxu0 %v6452_v29  ;;  %v6468_v29 = vld [vmem:[#allocation8 + $0x7b4] ss:$12 sps:$4 sm:$0xff]  }
 0x2f2   :  { %v2589_v4 = vadd.f32 %v5535_v0, %v6833_v25  ;;  %v5538_v44 = vadd.f32 %v5537_v2, %v5536_v1  ;;  %3987 = vmatprep.subr.bf16.mxu1 %v6368_v46  ;;  %v6459_v1 = vld [vmem:[#allocation8 + $0x6b0] ss:$12 sps:$4 sm:$0xff]   ;;  %v6487_v2 = vld [vmem:[#allocation8 + $0x848] ss:$12 sps:$4 sm:$0xff]  }
 0x2f4   :  { %v2592_v6 = vadd.f32 %v5538_v44, %v6835_v31  ;;  %v6390_v31 = vld [vmem:[#allocation5 + $0x868] ss:$48 sps:$4 sm:$0xff]   ;;  %4726 = vmatpush1.bf16.msra.mxu0 %v6450_v32  ;;  %v6498_v32 = vld [vmem:[#allocation8 + $0x7b8] ss:$12 sps:$4 sm:$0xff]  }
 0x2f5   :  { %3988 = vmatpush1.bf16.msra.mxu1 %v6366_v3  ;;  %4727 = vmatprep.subr.bf16.mxu0 %v6457_v37  ;;  %v6846_v3 = vld [vmem:[#allocation7 + $0x8] sm:$0xf]  ;;  %v6474_v37 = vld [vmem:[#allocation8 + $0x7e4] ss:$12 sps:$4 sm:$0xff]  }
 0x2f6   :  { %3989 = vmatprep.subr.bf16.mxu1 %v6371_v5  ;;  %v3380_v44 = vrot.slane %v6846_v3, %v6796_v11 }
 0x2f8   :  { %4728 = vmatpush1.bf16.msra.mxu0 %v6455_v39  ;;  %v6472_v39 = vld [vmem:[#allocation8 + $0x7e0] ss:$12 sps:$4 sm:$0xff]  }
 0x2f9   :  { %3990 = vmatpush1.bf16.msra.mxu1 %v6369_v7  ;;  %4740 = vmatprep.subr.bf16.mxu0 %v6462_v48  ;;  %v6475_v48 = vld [vmem:[#allocation8 + $0x7f8] ss:$12 sps:$4 sm:$0xff]  }
 0x2fa   :  { %4002 = vmatprep.subr.bf16.mxu1 %v6374_v50 }
 0x2fc   :  { %3992 = vmatmul.mubr.bf16.vlgmr.msra.gmra.mrb[28].mxu1 %v6774_v8  ;;  %v6387_v8 = vld [vmem:[#allocation5 + $0x808] ss:$48 sps:$4 sm:$0xff]  }
 0x2fd   :  { %4003 = vmatpush1.bf16.msra.mxu1 %v6372_v13  ;;  %4034 = vmatprep.mubr.bf16.mxu1 %v6675_v16 }
 0x2fe   :  { %4004 = vmatprep.subr.bf16.mxu1 %v6377_v14 }
 0x301   :  { %4005 = vmatpush1.bf16.msra.mxu1 %v6375_v15 }
 0x302   :  { %4006 = vmatprep.subr.bf16.mxu1 %v6380_v17 }
 0x305   :  { %4007 = vmatpush1.bf16.msra.mxu1 %v6378_v18 }
 0x306   :  { %4008 = vmatprep.subr.bf16.mxu1 %v6383_v19 }
 0x309   :  { %4009 = vmatpush1.bf16.msra.mxu1 %v6381_v21 }
 0x30a   :  { %4010 = vmatprep.subr.bf16.mxu1 %v6386_v22 }
 0x30d   :  { %4011 = vmatpush1.bf16.msra.mxu1 %v6384_v23 }
 0x30e   :  { %v5555_v25 = vpop.f32.mrb[16].mxu1  ;;  %4012 = vmatprep.subr.bf16.mxu1 %v6389_v24 }
 0x30f   :  { %v5556_v16 = vpop.f32.mrb[17].mxu1 }
 0x310   :  { %v5557_v27 = vadd.f32 %v5556_v16, %v5555_v25  ;;  %v5558_v28 = vpop.f32.mrb[18].mxu1  ;;  %v6488_v25 = vld [vmem:[#allocation8 + $0x788] ss:$12 sps:$4 sm:$0xff]   ;;  %v6492_v16 = vld [vmem:[#allocation8 + $0x860] ss:$12 sps:$4 sm:$0xff]  }
 0x311   :  { %4013 = vmatpush1.bf16.msra.mxu1 %v6387_v8  ;;  %v5559_v30 = vpop.f32.mrb[19].mxu1  ;;  %v6460_v8 = vld [vmem:[#allocation8 + $0x780] ss:$12 sps:$4 sm:$0xff]  }
 0x312   :  { %v3228_v33 = vadd.f32 %v5557_v27, %v2589_v4  ;;  %v5560_v34 = vadd.f32 %v5559_v30, %v5558_v28  ;;  %4014 = vmatprep.subr.bf16.mxu1 %v6392_v26  ;;  %v3376_v4 = vrot.slane %v6846_v3, %v6792_v9  ;;  %v6465_v26 = vld [vmem:[#allocation8 + $0x79c] ss:$12 sps:$4 sm:$0xff]   ;;  %v6463_v27 = vld [vmem:[#allocation8 + $0x798] ss:$12 sps:$4 sm:$0xff]   ;;  %v6493_v28 = vld [vmem:[#allocation8 + $0x7a0] ss:$12 sps:$4 sm:$0xff]  }
 0x313   :  { %v6497_v30 = vld [vmem:[#allocation8 + $0x878] ss:$12 sps:$4 sm:$0xff]  }
 0x314   :  { %v3231_v36 = vadd.f32 %v5560_v34, %v2592_v6  ;;  %v6502_v34 = vld [vmem:[#allocation8 + $0x890] ss:$12 sps:$4 sm:$0xff]  }
 0x315   :  { %4015 = vmatpush1.bf16.msra.mxu1 %v6390_v31  ;;  %v6466_v31 = vld [vmem:[#allocation8 + $0x7b0] ss:$12 sps:$4 sm:$0xff]  }
 0x316   :  { %4016 = vmatprep.subr.bf16.mxu1 %v6395_v35  ;;  %v6469_v35 = vld [vmem:[#allocation8 + $0x7c8] ss:$12 sps:$4 sm:$0xff]  }
 0x319   :  { %4017 = vmatpush1.bf16.msra.mxu1 %v6393_v38  ;;  %v6507_v38 = vld [vmem:[#allocation8 + $0x8a8] ss:$12 sps:$4 sm:$0xff]  }
 0x31a   :  { %5583 = vmatprep.subr.bf16.mxu1 %v6423_v40  ;;  %v6508_v40 = vld [vmem:[#allocation8 + $0x7e8] ss:$12 sps:$4 sm:$0xff]  }
 0x31c   :  { %4035 = vmatmul.mubr.bf16.vlgmr.msra.gmra.mrb[28].mxu1 %v6780_v43  ;;  %v6453_v43 = vld [vmem:[#allocation8 + $0x758] ss:$12 sps:$4 sm:$0xff]  }
 0x31d   :  { %5584 = vmatpush3.bf16.msra.mxu1 %v6424_v41  ;;  %v6477_v41 = vld [vmem:[#allocation8 + $0x7fc] ss:$12 sps:$4 sm:$0xff]  }
 0x31e   :  { %5585 = vmatprep.subr.bf16.mxu1 %v6428_v47  ;;  %v6512_v47 = vld [vmem:[#allocation8 + $0x8c0] ss:$12 sps:$4 sm:$0xff]  }
 0x321   :  { %5586 = vmatpush3.bf16.msra.mxu1 %v6429_v49  ;;  %v6513_v49 = vld [vmem:[#allocation8 + $0x800] ss:$12 sps:$4 sm:$0xff]  }
 0x322   :  { %5587 = vmatprep.subr.bf16.mxu1 %v6433_v51  ;;  %v6480_v51 = vld [vmem:[#allocation8 + $0x814] ss:$12 sps:$4 sm:$0xff]  }
 0x325   :  { %5588 = vmatpush3.bf16.msra.mxu1 %v6434_v20  ;;  %v6517_v20 = vld [vmem:[#allocation8 + $0x8d8] ss:$12 sps:$4 sm:$0xff]  }
 0x326   :  { %5589 = vmatprep.subr.bf16.mxu1 %v6438_v52  ;;  %v6478_v52 = vld [vmem:[#allocation8 + $0x810] ss:$12 sps:$4 sm:$0xff]  }
 0x329   :  { %5590 = vmatpush3.bf16.msra.mxu1 %v6439_v53  ;;  %v6518_v53 = vld [vmem:[#allocation8 + $0x818] ss:$12 sps:$4 sm:$0xff]  }
 0x32a   :  { %5591 = vmatprep.subr.bf16.mxu1 %v6443_v45  ;;  %v6483_v45 = vld [vmem:[#allocation8 + $0x82c] ss:$12 sps:$4 sm:$0xff]  }
 0x32d   :  { %5592 = vmatpush3.bf16.msra.mxu1 %v6444_v54  ;;  %v6522_v54 = vld [vmem:[#allocation8 + $0x8f0] ss:$12 sps:$4 sm:$0xff]  }
 0x32e   :  { %5593 = vmatprep.subr.bf16.mxu1 %v6448_v55  ;;  %v6481_v55 = vld [vmem:[#allocation8 + $0x828] ss:$12 sps:$4 sm:$0xff]  }
 0x32f   :  { %v5577_v57 = vpop.f32.mrb[20].mxu1 }
 0x330   :  { %v5578_v58 = vpop.f32.mrb[21].mxu1 }
 0x331   :  { %v5579_v59 = vadd.f32 %v5578_v58, %v5577_v57  ;;  %v5580_v60 = vpop.f32.mrb[22].mxu1  ;;  %5594 = vmatpush3.bf16.msra.mxu1 %v6449_v56  ;;  %v6523_v56 = vld [vmem:[#allocation8 + $0x830] ss:$12 sps:$4 sm:$0xff]   ;;  %v6484_v57 = vld [vmem:[#allocation8 + $0x840] ss:$12 sps:$4 sm:$0xff]  }
 0x332   :  { %v5581_v62 = vpop.f32.mrb[23].mxu1  ;;  %5595 = vmatprep.subr.bf16.mxu1 %v6453_v43  ;;  %v6486_v43 = vld [vmem:[#allocation8 + $0x844] ss:$12 sps:$4 sm:$0xff]   ;;  %v6491_v58 = vld [vmem:[#allocation8 + $0x85c] ss:$12 sps:$4 sm:$0xff]  }
 0x333   :  { %v6842_v46 = vadd.f32 %v5579_v59, %v3228_v33  ;;  %v5582_v63 = vadd.f32 %v5581_v62, %v5580_v60  ;;  %v6471_v33 = vld [vmem:[#allocation8 + $0x7cc] ss:$12 sps:$4 sm:$0xff]   ;;  %v6496_v60 = vld [vmem:[#allocation8 + $0x874] ss:$12 sps:$4 sm:$0xff]  }
 0x334   :  { %v6489_v59 = vld [vmem:[#allocation8 + $0x858] ss:$12 sps:$4 sm:$0xff]  }
 0x335   :  { %v6844_v0 = vadd.f32 %v5582_v63, %v3231_v36  ;;  %5596 = vmatpush3.bf16.msra.mxu1 %v6454_v61  ;;  %v6503_v36 = vld [vmem:[#allocation8 + $0x7d0] ss:$12 sps:$4 sm:$0xff]   ;;  %v6501_v62 = vld [vmem:[#allocation8 + $0x88c] ss:$12 sps:$4 sm:$0xff]  }
 0x336   :  { %5597 = vmatprep.subr.bf16.mxu1 %v6458_v42  ;;  %v6494_v61 = vld [vmem:[#allocation8 + $0x870] ss:$12 sps:$4 sm:$0xff]   ;;  %v6499_v42 = vld [vmem:[#allocation8 + $0x888] ss:$12 sps:$4 sm:$0xff]  }
 0x337   :  { %v6506_v63 = vld [vmem:[#allocation8 + $0x8a4] ss:$12 sps:$4 sm:$0xff]  }
 0x339   :  { %5598 = vmatpush3.bf16.msra.mxu1 %v6459_v1  ;;  %v6504_v1 = vld [vmem:[#allocation8 + $0x8a0] ss:$12 sps:$4 sm:$0xff]  }
 0x33a   :  { %5605 = vmatprep.subr.bf16.mxu1 %v6487_v2  ;;  %v6511_v2 = vld [vmem:[#allocation8 + $0x8bc] ss:$12 sps:$4 sm:$0xff]  }
 0x38f   :  { %v3950_v5 = vpop.f32.mrb[24].mxu1 }
 0x390   :  { %v5643_v6 = vadd.f32 %v3950_v5, %v3376_v4  ;;  %v3952_v7 = vpop.f32.mrb[25].mxu1  ;;  %v6514_v5 = vld [vmem:[#allocation8 + $0x8d0] ss:$12 sps:$4 sm:$0xff]  }
 0x391   :  { %v5644_v50 = vadd.f32 %v3952_v7, %v3380_v44  ;;  %v3954_v13 = vpop.f32.mrb[26].mxu1  ;;  %v6519_v7 = vld [vmem:[#allocation8 + $0x8e8] ss:$12 sps:$4 sm:$0xff]  }
 0x392   :  { %v5645_v14 = vadd.f32 %v3954_v13, %v3376_v4  ;;  %v3956_v15 = vpop.f32.mrb[27].mxu1  ;;  %v4045_v18 = vmax.f32 %v5643_v6, 0.0  ;;  %v6509_v4 = vld [vmem:[#allocation8 + $0x8b8] ss:$12 sps:$4 sm:$0xff]   ;;  %v3388_v13 = vrot.slane %v6846_v3, %v6798_v12 }
 0x393   :  { %v5646_v17 = vadd.f32 %v3956_v15, %v3380_v44  ;;  %v4046_v21 = vmax.f32 %v5644_v50, 0.0  ;;  %v6516_v44 = vld [vmem:[#allocation8 + $0x8d4] ss:$12 sps:$4 sm:$0xff]   ;;  %v6521_v6 = vld [vmem:[#allocation8 + $0x8ec] ss:$12 sps:$4 sm:$0xff]   ;;  %v3384_v50 = vrot.slane %v6846_v3, %v6794_v10 }
 0x394   :  { %v4049_v19 = vmax.f32 %v5645_v14, 0.0 }
 0x395   :  { %v4050_v22 = vmax.f32 %v5646_v17, 0.0 }
 0x396   :  { %v4053_v23 = vpack.c.bf16 %v4049_v19, %v4045_v18 }
 0x397   :  { %v4054_v24 = vpack.c.bf16 %v4050_v22, %v4046_v21 }
 0x399   :  { %4729 = vmatprep.mubr.bf16.mxu0 %v4054_v24  ;;  %4815 = vmatprep.mubr.bf16.mxu1 %v4054_v24 }
 0x39a   :  { %4730 = vmatmul.mubr.bf16.vlgmr.msra.gmra.mrb[8].mxu0 %v4053_v23  ;;  %4816 = vmatmul.mubr.bf16.vlgmr.msra.gmra.mrb[32].mxu1 %v4053_v23 }
 0x39b   :  { %4741 = vmatpush1.bf16.msra.mxu0 %v6460_v8  ;;  %5606 = vmatpush3.bf16.msra.mxu1 %v6488_v25 }
 0x39c   :  { %4742 = vmatprep.subr.bf16.mxu0 %v6465_v26  ;;  %5607 = vmatprep.subr.bf16.mxu1 %v6492_v16 }
 0x39f   :  { %4743 = vmatpush1.bf16.msra.mxu0 %v6463_v27  ;;  %5608 = vmatpush3.bf16.msra.mxu1 %v6493_v28 }
 0x3a0   :  { %4744 = vmatprep.subr.bf16.mxu0 %v6468_v29  ;;  %5609 = vmatprep.subr.bf16.mxu1 %v6497_v30 }
 0x3a3   :  { %4745 = vmatpush1.bf16.msra.mxu0 %v6466_v31  ;;  %5610 = vmatpush3.bf16.msra.mxu1 %v6498_v32  ;;  %v4871_v32 = vld [vmem:[#allocation10] sm:$0x7] }
 0x3a4   :  { %4746 = vmatprep.subr.bf16.mxu0 %v6471_v33  ;;  %5611 = vmatprep.subr.bf16.mxu1 %v6502_v34  ;;  %v4876_v33 = vrot.slane %v4871_v32, %v6792_v9  ;;  %v4880_v34 = vrot.slane %v4871_v32, %v6796_v11 }
 0x3a7   :  { %4747 = vmatpush1.bf16.msra.mxu0 %v6469_v35  ;;  %5612 = vmatpush3.bf16.msra.mxu1 %v6503_v36 }
 0x3a8   :  { %4748 = vmatprep.subr.bf16.mxu0 %v6474_v37  ;;  %5613 = vmatprep.subr.bf16.mxu1 %v6507_v38 }
 0x3ab   :  { %4749 = vmatpush1.bf16.msra.mxu0 %v6472_v39  ;;  %5614 = vmatpush3.bf16.msra.mxu1 %v6508_v40 }
 0x3ac   :  { %4750 = vmatprep.subr.bf16.mxu0 %v6477_v41  ;;  %5615 = vmatprep.subr.bf16.mxu1 %v6512_v47 }
 0x3af   :  { %4751 = vmatpush1.bf16.msra.mxu0 %v6475_v48  ;;  %5616 = vmatpush3.bf16.msra.mxu1 %v6513_v49 }
 0x3b0   :  { %4752 = vmatprep.subr.bf16.mxu0 %v6480_v51  ;;  %5617 = vmatprep.subr.bf16.mxu1 %v6517_v20 }
 0x3b3   :  { %4753 = vmatpush1.bf16.msra.mxu0 %v6478_v52  ;;  %5618 = vmatpush3.bf16.msra.mxu1 %v6518_v53  ;;  %v4884_v52 = vrot.slane %v4871_v32, %v6794_v10 }
 0x3b4   :  { %4754 = vmatprep.subr.bf16.mxu0 %v6483_v45  ;;  %5619 = vmatprep.subr.bf16.mxu1 %v6522_v54 }
 0x3b7   :  { %4755 = vmatpush1.bf16.msra.mxu0 %v6481_v55  ;;  %5620 = vmatpush3.bf16.msra.mxu1 %v6523_v56 }
 0x3b8   :  { %4756 = vmatprep.subr.bf16.mxu0 %v6486_v43 }
 0x3bb   :  { %4757 = vmatpush1.bf16.msra.mxu0 %v6484_v57 }
 0x3bc   :  { %4758 = vmatprep.subr.bf16.mxu0 %v6491_v58 }
 0x3bf   :  { %4759 = vmatpush1.bf16.msra.mxu0 %v6489_v59 }
 0x3c0   :  { %4760 = vmatprep.subr.bf16.mxu0 %v6496_v60 }
 0x3c3   :  { %4761 = vmatpush1.bf16.msra.mxu0 %v6494_v61 }
 0x3c4   :  { %4762 = vmatprep.subr.bf16.mxu0 %v6501_v62 }
 0x3c7   :  { %4763 = vmatpush1.bf16.msra.mxu0 %v6499_v42 }
 0x3c8   :  { %4764 = vmatprep.subr.bf16.mxu0 %v6506_v63 }
 0x3cb   :  { %4765 = vmatpush1.bf16.msra.mxu0 %v6504_v1 }
 0x3cc   :  { %4766 = vmatprep.subr.bf16.mxu0 %v6511_v2 }
 0x3cf   :  { %4767 = vmatpush1.bf16.msra.mxu0 %v6509_v4 }
 0x3d0   :  { %4768 = vmatprep.subr.bf16.mxu0 %v6516_v44 }
 0x3d3   :  { %4769 = vmatpush1.bf16.msra.mxu0 %v6514_v5 }
 0x3d4   :  { %4770 = vmatprep.subr.bf16.mxu0 %v6521_v6 }
 0x3d7   :  { %4771 = vmatpush1.bf16.msra.mxu0 %v6519_v7 }
 0x3ef   :  { %v4036_v14 = vpop.f32.mrb[28].mxu1 }
 0x3f0   :  { %v5647_v15 = vadd.f32 %v4036_v14, %v3384_v50  ;;  %v4038_v17 = vpop.f32.mrb[29].mxu1 }
 0x3f1   :  { %v5648_v18 = vadd.f32 %v4038_v17, %v3388_v13  ;;  %v4040_v19 = vpop.f32.mrb[30].mxu1 }
 0x3f2   :  { %v5649_v21 = vadd.f32 %v4040_v19, %v3384_v50  ;;  %v4042_v22 = vpop.f32.mrb[31].mxu1  ;;  %v4047_v24 = vmax.f32 %v5647_v15, 0.0 }
 0x3f3   :  { %v5650_v23 = vadd.f32 %v4042_v22, %v3388_v13  ;;  %v4048_v25 = vmax.f32 %v5648_v18, 0.0 }
 0x3f4   :  { %v4051_v8 = vmax.f32 %v5649_v21, 0.0 }
 0x3f5   :  { %v4052_v26 = vmax.f32 %v5650_v23, 0.0 }
 0x3f6   :  { %v4055_v16 = vpack.c.bf16 %v4051_v8, %v4047_v24 }
 0x3f7   :  { %v4056_v27 = vpack.c.bf16 %v4052_v26, %v4048_v25 }
 0x3f9   :  { %4772 = vmatprep.mubr.bf16.mxu0 %v4056_v27  ;;  %4856 = vmatprep.mubr.bf16.mxu1 %v4056_v27 }
 0x3fa   :  { %4773 = vmatmul.mubr.bf16.vlgmr.msra.gmra.mrb[8].mxu0 %v4055_v16  ;;  %4857 = vmatmul.mubr.bf16.vlgmr.msra.gmra.mrb[36].mxu1 %v4055_v16 }
 0x46d   :  { %v5599_v28 = vpop.f32.mrb[32].mxu1 }
 0x46e   :  { %v5600_v12 = vpop.f32.mrb[33].mxu1 }
 0x46f   :  { %v5601_v3 = vadd.f32 %v5600_v12, %v5599_v28  ;;  %v5602_v29 = vpop.f32.mrb[34].mxu1 }
 0x470   :  { %v5603_v30 = vpop.f32.mrb[35].mxu1 }
 0x471   :  { %v5604_v31 = vadd.f32 %v5603_v30, %v5602_v29 }
 0x4cd   :  { %v4774_v35 = vpop.f32.mrb[8].mxu0  ;;  %v5621_v36 = vpop.f32.mrb[36].mxu1 }
 0x4ce   :  { %v4888_v37 = vadd.f32 %v4876_v33, %v4774_v35  ;;  %v4776_v38 = vpop.f32.mrb[9].mxu0  ;;  %v5622_v39 = vpop.f32.mrb[37].mxu1 }
 0x4cf   :  { %v4889_v40 = vadd.f32 %v4880_v34, %v4776_v38  ;;  %v5623_v41 = vadd.f32 %v5622_v39, %v5621_v36  ;;  %v4778_v47 = vpop.f32.mrb[10].mxu0  ;;  %v5624_v48 = vpop.f32.mrb[38].mxu1 }
 0x4d0   :  { %4894 = vst [vmem:[#allocation11] sm:$0xff] %v4888_v37  ;;  %v4891_v49 = vadd.f32 %v4876_v33, %v4778_v47  ;;  %v4780_v51 = vpop.f32.mrb[11].mxu0  ;;  %v5625_v20 = vpop.f32.mrb[39].mxu1 }
 0x4d1   :  { %4895 = vst [vmem:[#allocation11 + $0x8] sm:$0xff] %v4889_v40  ;;  %v4859_v53 = vadd.f32 %v5623_v41, %v5601_v3  ;;  %v4892_v9 = vadd.f32 %v4880_v34, %v4780_v51  ;;  %v5626_v45 = vadd.f32 %v5625_v20, %v5624_v48 }
 0x4d2   :  { %4897 = vst [vmem:[#allocation11 + $0x18] sm:$0xff] %v4891_v49 }
 0x4d3   :  { %v4867_v11 = vadd.f32 %v4859_v53, %v6842_v46  ;;  %4898 = vst [vmem:[#allocation11 + $0x20] sm:$0xff] %v4892_v9  ;;  %v4862_v54 = vadd.f32 %v5626_v45, %v5604_v31 }
 0x4d5   :  { %v4890_v55 = vadd.f32 %v4884_v52, %v4867_v11  ;;  %v4870_v56 = vadd.f32 %v4862_v54, %v6844_v0 }
 0x4d7   :  { %4896 = vst [vmem:[#allocation11 + $0x10] sm:$0xff] %v4890_v55  ;;  %v4893_v43 = vadd.f32 %v4884_v52, %v4870_v56 }
 0x4d9   :  { %4899 = vst [vmem:[#allocation11 + $0x28] sm:$0xff] %v4893_v43 }
 0x4da   :  { %6645 = shalt.err (!%p6642_p2)
}
 0x4db   :  { %s6646_s10 = scalar_lea.hbm %s6881_s5, 768 }
 0x4dc   :  { %p6647_p3 = scmp.ne.s32.totalorder %s6881_s5, %s6646_s10  ;;  %p6650_p4 = scmp.lt.u32.totalorder %s6646_s10, %s6881_s5 }
 0x4de   :  { %p6652_p5 = pnand %p6650_p4, %p6647_p3 }
 0x4e0   :  { %6655 = shalt.err (!%p6652_p5)
}
 0x4e1   :  { %4911 = dma.vmem_to_hbm [thread:$0]  %s4906_s6, 768, %s6881_s5, [#allocation4], %s6671_s3, %s6671_s3, %s6672_s30  }
 0x4e2   :  { %6662 = dma.done.wait [#allocation4], 768  }
 0x4e3   :  { %6663 = vsyncadd [#allocation4], 4294966528 }
 0x4e4   :  { %4915 = vsyncpa [#allocation3], 1 }
 0x4e5   :  { %4916 = vsyncpa [#allocation6], 1 }
 0x4e6   :  { %4917 = vsyncpa [#allocation9], 1 }
 0x4e7   :  { %4918 = vsyncpa [#allocation4], 1 }

</bundles_post_ra>
